<compile_context>
chip_gen: v7x
topology: tpu7x:2x2x1
jax: 0.10.0
libtpu: 0.0.40
codegen_flags: <defaults>
</compile_context>

<pallas_src>
import functools

import jax
import jax.numpy as jnp
from jax import lax
from jax.experimental import pallas as pl
from jax.experimental.pallas import tpu as pltpu

_N_STATS = 16   # [cnt, Σ|l1|m, (S1,S2) x {f_dx,f_dy,f_dz,y_dx,y_dy,y_dz}, pad]
_N_PAR = 16     # [(mean, inv_std) x {f_dx,f_dy,f_dz,y_dx,y_dy,y_dz}, pad]


# ---------------------------------------------------------------------------
# in-kernel helpers
# ---------------------------------------------------------------------------
def _boundary_masks(td, hw, h, w):
    """Hoisted boundary masks (one iota), reused for both fld and y_hat."""
    lane = lax.broadcasted_iota(jnp.int32, (td, hw), 1)
    w_keep = (lane % w) != (w - 1)          # not the last W element of a row
    h_keep = lane < (h - 1) * w             # not the last H row of a plane
    d_local = lax.broadcasted_iota(jnp.int32, (td, 1), 0) < (td - 1)
    return w_keep, h_keep, d_local


def _axis_fwd_diff(a, halo, axis_id, w_keep, h_keep, d_local, w):
    """Forward finite difference of a (TD, H*W) masked field.

    axis_id: 0 = W (lane axis), 1 = H (stride W in lanes), 2 = D (sublanes).
    `halo` is the (1, H*W) masked plane following this tile along D (clamped
    to the volume's last plane, which makes the boundary difference zero).
    # TODO(synk): `im_morphology` is defined outside the provided module;
    # forward finite differences along W/H/D are used as its gradient operator.
    # (jnp.roll is used here; pltpu.roll is the XLU-native alternative.)
    """
    if axis_id == 0:
        return jnp.where(w_keep, jnp.roll(a, -1, axis=1) - a, 0.0)
    if axis_id == 1:
        return jnp.where(h_keep, jnp.roll(a, -w, axis=1) - a, 0.0)
    nxt = jnp.where(d_local, jnp.roll(a, -1, axis=0), halo)
    return nxt - a


def _start_halo_copies(y_hbm, f_hbm, m_hbm, y_halo, f_halo, m_halo, sem,
                       td, d_full):
    """DMA the first plane of the next D tile (clamped) into VMEM scratch."""
    b = pl.program_id(0)
    dblk = pl.program_id(1)
    p = jnp.minimum(dblk * td + td, d_full - 1)
    copies = (
        pltpu.make_async_copy(y_hbm.at[b, pl.ds(p, 1), :], y_halo, sem.at[0]),
        pltpu.make_async_copy(f_hbm.at[b, pl.ds(p, 1), :], f_halo, sem.at[1]),
        pltpu.make_async_copy(m_hbm.at[b, pl.ds(p, 1), :], m_halo, sem.at[2]),
    )
    for c in copies:
        c.start()
    return copies


# ---------------------------------------------------------------------------
# pass 1: masked moments
# ---------------------------------------------------------------------------
def _stats_kernel(x_ref, y_ref, f_ref, m_ref,
                  y_hbm, f_hbm, m_hbm,
                  stats_ref,
                  y_halo, f_halo, m_halo, sem,
                  *, td, hw, d_full, h, w):
    copies = _start_halo_copies(y_hbm, f_hbm, m_hbm, y_halo, f_halo, m_halo,
                                sem, td, d_full)

    first = (pl.program_id(0) == 0) & (pl.program_id(1) == 0)

    @pl.when(first)
    def _init():
        for k in range(_N_STATS):
            stats_ref[k] = 0.0

    m = m_ref[...]                 # binary mask used directly as the weight
    x = x_ref[...]
    ym = y_ref[...] * m            # y_hat *= msk
    fm = f_ref[...] * m            # fld   *= msk

    # l_cycle = mean(|10*|x|*(y_hat - x)|) over msk==1 voxels
    stats_ref[0] = stats_ref[0] + jnp.sum(m)
    stats_ref[1] = stats_ref[1] + jnp.sum(
        jnp.abs(10.0 * jnp.abs(x) * (ym - x)) * m)

    w_keep, h_keep, d_local = _boundary_masks(td, hw, h, w)

    for c in copies:
        c.wait()
    mh = m_halo[...]
    y_h = y_halo[...] * mh
    f_h = f_halo[...] * mh

    # Σ g·m and Σ g²·m, one axis at a time (fused streaming form); note
    # m ∈ {0,1} so Σ g²·m = Σ (g·m)·g.
    for ax in range(3):
        fd = _axis_fwd_diff(fm, f_h, ax, w_keep, h_keep, d_local, w)
        fdm = fd * m
        stats_ref[2 + 2 * ax] = stats_ref[2 + 2 * ax] + jnp.sum(fdm)
        stats_ref[3 + 2 * ax] = stats_ref[3 + 2 * ax] + jnp.sum(fdm * fd)
        yd = _axis_fwd_diff(ym, y_h, ax, w_keep, h_keep, d_local, w)
        ydm = yd * m
        stats_ref[8 + 2 * ax] = stats_ref[8 + 2 * ax] + jnp.sum(ydm)
        stats_ref[9 + 2 * ax] = stats_ref[9 + 2 * ax] + jnp.sum(ydm * yd)


# ---------------------------------------------------------------------------
# pass 2: normalized-gradient L1
# ---------------------------------------------------------------------------
def _grad_kernel(par_ref, y_ref, f_ref, m_ref,
                 y_hbm, f_hbm, m_hbm,
                 acc_ref,
                 y_halo, f_halo, m_halo, sem,
                 *, td, hw, d_full, h, w):
    copies = _start_halo_copies(y_hbm, f_hbm, m_hbm, y_halo, f_halo, m_halo,
                                sem, td, d_full)

    first = (pl.program_id(0) == 0) & (pl.program_id(1) == 0)

    @pl.when(first)
    def _init():
        for k in range(8):
            acc_ref[k] = 0.0

    m = m_ref[...]
    ym = y_ref[...] * m
    fm = f_ref[...] * m

    w_keep, h_keep, d_local = _boundary_masks(td, hw, h, w)

    for c in copies:
        c.wait()
    mh = m_halo[...]
    y_h = y_halo[...] * mh
    f_h = f_halo[...] * mh

    total = jnp.float32(0.0)
    for ax in range(3):
        # TODO(synk): `mean_std` is defined outside the provided module;
        # (v - mean) / unbiased_std over the selected voxels is used here.
        fd = _axis_fwd_diff(fm, f_h, ax, w_keep, h_keep, d_local, w)
        f_n = jnp.abs((fd - par_ref[2 * ax]) * par_ref[2 * ax + 1])
        yd = _axis_fwd_diff(ym, y_h, ax, w_keep, h_keep, d_local, w)
        y_n = jnp.abs((yd - par_ref[6 + 2 * ax]) * par_ref[7 + 2 * ax])
        total = total + jnp.sum(jnp.abs(y_n - f_n) * m)
    acc_ref[0] = acc_ref[0] + total


# ---------------------------------------------------------------------------
# wrapper
# ---------------------------------------------------------------------------
@functools.partial(jax.jit, static_argnames=("d_tile",))
def net_loss(y_hat, x, fld, msk, *, d_tile=8):
    """All inputs: identically-shaped NCDHW arrays; msk is a binary 0/1 mask.
    Returns (l_cycle, l_grad) as float32 scalars."""
    n, c, d, h, w = y_hat.shape
    b = n * c
    hw = h * w
    f32 = jnp.float32

    def to3d(a):                       # lane-dense layout: lanes = H*W
        return a.astype(f32).reshape(b, d, hw)

    xr, yr, fr, mr = to3d(x), to3d(y_hat), to3d(fld), to3d(msk)

    # D-tile must be a multiple of 8 sublanes (or the full D extent).
    td = d_tile if (d % d_tile == 0 and d_tile % 8 == 0) else d
    nd = d // td
    grid = (b, nd)

    blk = pl.BlockSpec((None, td, hw), lambda i, j: (i, j, 0))
    hbm = pl.BlockSpec(memory_space=pl.ANY)
    smem = pl.BlockSpec(memory_space=pltpu.MemorySpace.SMEM)
    scratch = [
        pltpu.VMEM((1, hw), f32),          # y_hat halo plane
        pltpu.VMEM((1, hw), f32),          # fld   halo plane
        pltpu.VMEM((1, hw), f32),          # msk   halo plane
        pltpu.SemaphoreType.DMA((3,)),
    ]
    block_bytes = td * hw * 4
    cparams = pltpu.CompilerParams(
        # Both grid axes feed a single scalar accumulator -> sequential.
        # TODO(synk): v7x megacore: per-core partial sums + "parallel" B axis.
        dimension_semantics=("arbitrary", "arbitrary"),
        vmem_limit_bytes=int(min(64 << 20,
                                 max(16 << 20, 12 * block_bytes + (2 << 20)))),
    )
    kern_kw = dict(td=td, hw=hw, d_full=d, h=h, w=w)

    # ---- pass 1: masked moments -------------------------------------------
    stats = pl.pallas_call(
        functools.partial(_stats_kernel, **kern_kw),
        out_shape=jax.ShapeDtypeStruct((_N_STATS,), f32),
        grid_spec=pltpu.PrefetchScalarGridSpec(
            num_scalar_prefetch=0,
            grid=grid,
            in_specs=[blk, blk, blk, blk, hbm, hbm, hbm],
            out_specs=smem,
            scratch_shapes=scratch,
        ),
        compiler_params=cparams,
    )(xr, yr, fr, mr, yr, fr, mr)

    cnt = stats[0]
    cnt_s = jnp.maximum(cnt, 1.0)                      # guard: empty mask
    l_cycle = stats[1] / cnt_s

    s1 = stats[2:14:2]
    s2 = stats[3:14:2]
    mean = s1 / cnt_s
    var = (s2 - s1 * s1 / cnt_s) / jnp.maximum(cnt - 1.0, 1.0)  # unbiased
    inv_std = 1.0 / jnp.sqrt(jnp.maximum(var, 1e-30))

    params = jnp.zeros((_N_PAR,), f32)
    params = params.at[0:12:2].set(mean)
    params = params.at[1:12:2].set(inv_std)

    # ---- pass 2: normalized-gradient L1 -------------------------------------
    acc = pl.pallas_call(
        functools.partial(_grad_kernel, **kern_kw),
        out_shape=jax.ShapeDtypeStruct((8,), f32),
        grid_spec=pltpu.PrefetchScalarGridSpec(
            num_scalar_prefetch=0,
            grid=grid,
            in_specs=[smem, blk, blk, blk, hbm, hbm, hbm],
            out_specs=smem,
            scratch_shapes=scratch,
        ),
        compiler_params=cparams,
    )(params, yr, fr, mr, yr, fr, mr)

    l_grad = acc[0] / (3.0 * cnt_s)
    return l_cycle, l_grad


# ---------------------------------------------------------------------------
# pure-JAX reference (mirrors the torch forward, boolean-index style)
# ---------------------------------------------------------------------------
def _fwd_diff_ref(a, axis):
    n = a.shape[axis]
    shifted = jnp.roll(a, shift=-1, axis=axis)
    diff = shifted - a
    idx = lax.broadcasted_iota(jnp.int32, a.shape, axis)
    return jnp.where(idx < (n - 1), diff, jnp.zeros_like(diff))


def _net_loss_ref(y_hat, x, fld, msk):
    y_hat = y_hat * msk
    fld = fld * msk
    sel = (msk == 1.0)

    l1 = 10.0 * jnp.abs(x) * (y_hat - x)
    l_cycle = jnp.mean(jnp.abs(l1[sel]))

    def morph(v):
        return [_fwd_diff_ref(v, ax) for ax in (4, 3, 2)]    # W, H, D on NCDHW

    def mean_std_abs(v1d):
        mean = jnp.mean(v1d)
        var = jnp.sum((v1d - mean) ** 2) / (v1d.shape[0] - 1.0)
        return jnp.abs((v1d - mean) / jnp.sqrt(var))

    l_grad = 0.0
    for fg, yg in zip(morph(fld), morph(y_hat)):
        f_n = mean_std_abs(fg[sel])
        y_n = mean_std_abs(yg[sel])
        l_grad = l_grad + jnp.mean(jnp.abs(y_n - f_n))
    return l_cycle, l_grad / 3.0


if __name__ == "__main__":
    key = jax.random.PRNGKey(0)
    k1, k2, k3, k4 = jax.random.split(key, 4)
    shape = (2, 1, 16, 16, 16)                              # N, C, D, H, W
    y_hat = jax.random.normal(k1, shape, jnp.float32)
    x = jax.random.normal(k2, shape, jnp.float32)
    fld = jax.random.normal(k3, shape, jnp.float32)
    msk = (jax.random.uniform(k4, shape) > 0.3).astype(jnp.float32)

    l_cycle, l_grad = net_loss(y_hat, x, fld, msk)
    jax.block_until_ready((l_cycle, l_grad))

    rc, rg = _net_loss_ref(y_hat, x, fld, msk)
    assert jnp.allclose(l_cycle, rc, rtol=2e-3, atol=1e-4), (l_cycle, rc)
    assert jnp.allclose(l_grad, rg, rtol=2e-3, atol=1e-4), (l_grad, rg)

    print("KERNEL_OK")
</pallas_src>

<mosaic_0001>
module attributes {stable_mosaic.version = 11 : i64} {
  func.func @_stats_kernel(%arg0: i32, %arg1: i32, %arg2: memref<1x8x256xf32, #tpu.memory_space<vmem>>, %arg3: memref<1x8x256xf32, #tpu.memory_space<vmem>>, %arg4: memref<1x8x256xf32, #tpu.memory_space<vmem>>, %arg5: memref<1x8x256xf32, #tpu.memory_space<vmem>>, %arg6: memref<2x16x256xf32, #tpu.memory_space<any>>, %arg7: memref<2x16x256xf32, #tpu.memory_space<any>>, %arg8: memref<2x16x256xf32, #tpu.memory_space<any>>, %arg9: memref<16xf32, #tpu.memory_space<smem>>, %arg10: memref<1x256xf32, #tpu.memory_space<vmem>>, %arg11: memref<1x256xf32, #tpu.memory_space<vmem>>, %arg12: memref<1x256xf32, #tpu.memory_space<vmem>>, %arg13: memref<3x!tpu.dma_semaphore, #tpu.memory_space<semaphore_mem>>) attributes {dimension_semantics = [#tpu.dimension_semantics<arbitrary>, #tpu.dimension_semantics<arbitrary>], iteration_bounds = array<i64: 2, 2>, scalar_prefetch = 0 : i64, scratch_operands = 4 : i64, tpu.core_type = #tpu.core_type<tc>, window_params = [{transform_indices = @transform_0, window_bounds = array<i64: 1, 8, 256>}, {transform_indices = @transform_1, window_bounds = array<i64: 1, 8, 256>}, {transform_indices = @transform_2, window_bounds = array<i64: 1, 8, 256>}, {transform_indices = @transform_3, window_bounds = array<i64: 1, 8, 256>}, {}, {}, {}, {transform_indices = @transform_7, window_bounds = array<i64: 16>}]} {
    %c8_i32 = arith.constant 8 : i32
    %0 = arith.muli %arg1, %c8_i32 : i32
    %c8_i32_0 = arith.constant 8 : i32
    %1 = arith.addi %0, %c8_i32_0 : i32
    %c15_i32 = arith.constant 15 : i32
    %2 = arith.minsi %1, %c15_i32 : i32
    %c0_i32 = arith.constant 0 : i32
    %c0_i32_1 = arith.constant 0 : i32
    %3 = tpu.memref_slice %arg6[%arg0, %2, %c0_i32_1] : memref<2x16x256xf32, #tpu.memory_space<any>> -> memref<1x1x256xf32, #tpu.memory_space<any>>
    %4 = tpu.memref_squeeze %3 : memref<1x1x256xf32, #tpu.memory_space<any>> -> memref<1x256xf32, #tpu.memory_space<any>>
    %5 = tpu.memref_slice %arg13[%c0_i32] : memref<3x!tpu.dma_semaphore, #tpu.memory_space<semaphore_mem>> -> memref<1x!tpu.dma_semaphore, #tpu.memory_space<semaphore_mem>>
    %6 = tpu.memref_squeeze %5 : memref<1x!tpu.dma_semaphore, #tpu.memory_space<semaphore_mem>> -> memref<!tpu.dma_semaphore, #tpu.memory_space<semaphore_mem>>
    tpu.enqueue_dma source(%4 : memref<1x256xf32, #tpu.memory_space<any>>) target(%arg10 : memref<1x256xf32, #tpu.memory_space<vmem>>) target_semaphore(%6 : memref<!tpu.dma_semaphore, #tpu.memory_space<semaphore_mem>>)
    %c1_i32 = arith.constant 1 : i32
    %c0_i32_2 = arith.constant 0 : i32
    %7 = tpu.memref_slice %arg7[%arg0, %2, %c0_i32_2] : memref<2x16x256xf32, #tpu.memory_space<any>> -> memref<1x1x256xf32, #tpu.memory_space<any>>
    %8 = tpu.memref_squeeze %7 : memref<1x1x256xf32, #tpu.memory_space<any>> -> memref<1x256xf32, #tpu.memory_space<any>>
    %9 = tpu.memref_slice %arg13[%c1_i32] : memref<3x!tpu.dma_semaphore, #tpu.memory_space<semaphore_mem>> -> memref<1x!tpu.dma_semaphore, #tpu.memory_space<semaphore_mem>>
    %10 = tpu.memref_squeeze %9 : memref<1x!tpu.dma_semaphore, #tpu.memory_space<semaphore_mem>> -> memref<!tpu.dma_semaphore, #tpu.memory_space<semaphore_mem>>
    tpu.enqueue_dma source(%8 : memref<1x256xf32, #tpu.memory_space<any>>) target(%arg11 : memref<1x256xf32, #tpu.memory_space<vmem>>) target_semaphore(%10 : memref<!tpu.dma_semaphore, #tpu.memory_space<semaphore_mem>>)
    %c2_i32 = arith.constant 2 : i32
    %c0_i32_3 = arith.constant 0 : i32
    %11 = tpu.memref_slice %arg8[%arg0, %2, %c0_i32_3] : memref<2x16x256xf32, #tpu.memory_space<any>> -> memref<1x1x256xf32, #tpu.memory_space<any>>
    %12 = tpu.memref_squeeze %11 : memref<1x1x256xf32, #tpu.memory_space<any>> -> memref<1x256xf32, #tpu.memory_space<any>>
    %13 = tpu.memref_slice %arg13[%c2_i32] : memref<3x!tpu.dma_semaphore, #tpu.memory_space<semaphore_mem>> -> memref<1x!tpu.dma_semaphore, #tpu.memory_space<semaphore_mem>>
    %14 = tpu.memref_squeeze %13 : memref<1x!tpu.dma_semaphore, #tpu.memory_space<semaphore_mem>> -> memref<!tpu.dma_semaphore, #tpu.memory_space<semaphore_mem>>
    tpu.enqueue_dma source(%12 : memref<1x256xf32, #tpu.memory_space<any>>) target(%arg12 : memref<1x256xf32, #tpu.memory_space<vmem>>) target_semaphore(%14 : memref<!tpu.dma_semaphore, #tpu.memory_space<semaphore_mem>>)
    %c0_i32_4 = arith.constant 0 : i32
    %15 = arith.cmpi eq, %arg0, %c0_i32_4 : i32
    %c0_i32_5 = arith.constant 0 : i32
    %16 = arith.cmpi eq, %arg1, %c0_i32_5 : i32
    %17 = arith.andi %15, %16 : i1
    %18 = arith.extui %17 : i1 to i32
    %c0_i32_6 = arith.constant 0 : i32
    %19 = arith.cmpi ne, %18, %c0_i32_6 : i32
    scf.if %19 {
      %cst_69 = arith.constant 0.000000e+00 : f32
      %c0_70 = arith.constant 0 : index
      %230 = memref.load %arg9[%c0_70] : memref<16xf32, #tpu.memory_space<smem>>
      memref.store %cst_69, %arg9[%c0_70] : memref<16xf32, #tpu.memory_space<smem>>
      %cst_71 = arith.constant 0.000000e+00 : f32
      %c1_72 = arith.constant 1 : index
      %231 = memref.load %arg9[%c1_72] : memref<16xf32, #tpu.memory_space<smem>>
      memref.store %cst_71, %arg9[%c1_72] : memref<16xf32, #tpu.memory_space<smem>>
      %cst_73 = arith.constant 0.000000e+00 : f32
      %c2_74 = arith.constant 2 : index
      %232 = memref.load %arg9[%c2_74] : memref<16xf32, #tpu.memory_space<smem>>
      memref.store %cst_73, %arg9[%c2_74] : memref<16xf32, #tpu.memory_space<smem>>
      %cst_75 = arith.constant 0.000000e+00 : f32
      %c3_76 = arith.constant 3 : index
      %233 = memref.load %arg9[%c3_76] : memref<16xf32, #tpu.memory_space<smem>>
      memref.store %cst_75, %arg9[%c3_76] : memref<16xf32, #tpu.memory_space<smem>>
      %cst_77 = arith.constant 0.000000e+00 : f32
      %c4_78 = arith.constant 4 : index
      %234 = memref.load %arg9[%c4_78] : memref<16xf32, #tpu.memory_space<smem>>
      memref.store %cst_77, %arg9[%c4_78] : memref<16xf32, #tpu.memory_space<smem>>
      %cst_79 = arith.constant 0.000000e+00 : f32
      %c5_80 = arith.constant 5 : index
      %235 = memref.load %arg9[%c5_80] : memref<16xf32, #tpu.memory_space<smem>>
      memref.store %cst_79, %arg9[%c5_80] : memref<16xf32, #tpu.memory_space<smem>>
      %cst_81 = arith.constant 0.000000e+00 : f32
      %c6_82 = arith.constant 6 : index
      %236 = memref.load %arg9[%c6_82] : memref<16xf32, #tpu.memory_space<smem>>
      memref.store %cst_81, %arg9[%c6_82] : memref<16xf32, #tpu.memory_space<smem>>
      %cst_83 = arith.constant 0.000000e+00 : f32
      %c7_84 = arith.constant 7 : index
      %237 = memref.load %arg9[%c7_84] : memref<16xf32, #tpu.memory_space<smem>>
      memref.store %cst_83, %arg9[%c7_84] : memref<16xf32, #tpu.memory_space<smem>>
      %cst_85 = arith.constant 0.000000e+00 : f32
      %c8_86 = arith.constant 8 : index
      %238 = memref.load %arg9[%c8_86] : memref<16xf32, #tpu.memory_space<smem>>
      memref.store %cst_85, %arg9[%c8_86] : memref<16xf32, #tpu.memory_space<smem>>
      %cst_87 = arith.constant 0.000000e+00 : f32
      %c9_88 = arith.constant 9 : index
      %239 = memref.load %arg9[%c9_88] : memref<16xf32, #tpu.memory_space<smem>>
      memref.store %cst_87, %arg9[%c9_88] : memref<16xf32, #tpu.memory_space<smem>>
      %cst_89 = arith.constant 0.000000e+00 : f32
      %c10_90 = arith.constant 10 : index
      %240 = memref.load %arg9[%c10_90] : memref<16xf32, #tpu.memory_space<smem>>
      memref.store %cst_89, %arg9[%c10_90] : memref<16xf32, #tpu.memory_space<smem>>
      %cst_91 = arith.constant 0.000000e+00 : f32
      %c11_92 = arith.constant 11 : index
      %241 = memref.load %arg9[%c11_92] : memref<16xf32, #tpu.memory_space<smem>>
      memref.store %cst_91, %arg9[%c11_92] : memref<16xf32, #tpu.memory_space<smem>>
      %cst_93 = arith.constant 0.000000e+00 : f32
      %c12_94 = arith.constant 12 : index
      %242 = memref.load %arg9[%c12_94] : memref<16xf32, #tpu.memory_space<smem>>
      memref.store %cst_93, %arg9[%c12_94] : memref<16xf32, #tpu.memory_space<smem>>
      %cst_95 = arith.constant 0.000000e+00 : f32
      %c13_96 = arith.constant 13 : index
      %243 = memref.load %arg9[%c13_96] : memref<16xf32, #tpu.memory_space<smem>>
      memref.store %cst_95, %arg9[%c13_96] : memref<16xf32, #tpu.memory_space<smem>>
      %cst_97 = arith.constant 0.000000e+00 : f32
      %c14 = arith.constant 14 : index
      %244 = memref.load %arg9[%c14] : memref<16xf32, #tpu.memory_space<smem>>
      memref.store %cst_97, %arg9[%c14] : memref<16xf32, #tpu.memory_space<smem>>
      %cst_98 = arith.constant 0.000000e+00 : f32
      %c15 = arith.constant 15 : index
      %245 = memref.load %arg9[%c15] : memref<16xf32, #tpu.memory_space<smem>>
      memref.store %cst_98, %arg9[%c15] : memref<16xf32, #tpu.memory_space<smem>>
    } else {
    }
    %c0 = arith.constant 0 : index
    %c0_7 = arith.constant 0 : index
    %c0_8 = arith.constant 0 : index
    %20 = vector.load %arg5[%c0, %c0_7, %c0_8] : memref<1x8x256xf32, #tpu.memory_space<vmem>>, vector<1x8x256xf32>
    %21 = vector.shape_cast %20 : vector<1x8x256xf32> to vector<8x256xf32>
    %c0_9 = arith.constant 0 : index
    %c0_10 = arith.constant 0 : index
    %c0_11 = arith.constant 0 : index
    %22 = vector.load %arg2[%c0_9, %c0_10, %c0_11] : memref<1x8x256xf32, #tpu.memory_space<vmem>>, vector<1x8x256xf32>
    %23 = vector.shape_cast %22 : vector<1x8x256xf32> to vector<8x256xf32>
    %c0_12 = arith.constant 0 : index
    %c0_13 = arith.constant 0 : index
    %c0_14 = arith.constant 0 : index
    %24 = vector.load %arg3[%c0_12, %c0_13, %c0_14] : memref<1x8x256xf32, #tpu.memory_space<vmem>>, vector<1x8x256xf32>
    %25 = vector.shape_cast %24 : vector<1x8x256xf32> to vector<8x256xf32>
    %26 = arith.mulf %25, %21 : vector<8x256xf32>
    %c0_15 = arith.constant 0 : index
    %c0_16 = arith.constant 0 : index
    %c0_17 = arith.constant 0 : index
    %27 = vector.load %arg4[%c0_15, %c0_16, %c0_17] : memref<1x8x256xf32, #tpu.memory_space<vmem>>, vector<1x8x256xf32>
    %28 = vector.shape_cast %27 : vector<1x8x256xf32> to vector<8x256xf32>
    %29 = arith.mulf %28, %21 : vector<8x256xf32>
    %c0_18 = arith.constant 0 : index
    %30 = memref.load %arg9[%c0_18] : memref<16xf32, #tpu.memory_space<smem>>
    %31 = vector.shape_cast %21 : vector<8x256xf32> to vector<1x8x256xf32>
    %cst = arith.constant dense<0.000000e+00> : vector<1xf32>
    %32 = vector.multi_reduction <add>, %31, %cst [1, 2] : vector<1x8x256xf32> to vector<1xf32>
    %33 = vector.shape_cast %32 : vector<1xf32> to vector<1x1x1xf32>
    %34 = vector.extract %33[0, 0, 0] : f32 from vector<1x1x1xf32>
    %35 = arith.addf %30, %34 : f32
    %c0_19 = arith.constant 0 : index
    %36 = memref.load %arg9[%c0_19] : memref<16xf32, #tpu.memory_space<smem>>
    memref.store %35, %arg9[%c0_19] : memref<16xf32, #tpu.memory_space<smem>>
    %c1 = arith.constant 1 : index
    %37 = memref.load %arg9[%c1] : memref<16xf32, #tpu.memory_space<smem>>
    %38 = math.absf %23 : vector<8x256xf32>
    %cst_20 = arith.constant 1.000000e+01 : f32
    %39 = vector.broadcast %cst_20 : f32 to vector<8x256xf32>
    %40 = arith.mulf %39, %38 : vector<8x256xf32>
    %41 = arith.subf %26, %23 : vector<8x256xf32>
    %42 = arith.mulf %40, %41 : vector<8x256xf32>
    %43 = math.absf %42 : vector<8x256xf32>
    %44 = arith.mulf %43, %21 : vector<8x256xf32>
    %45 = vector.shape_cast %44 : vector<8x256xf32> to vector<1x8x256xf32>
    %cst_21 = arith.constant dense<0.000000e+00> : vector<1xf32>
    %46 = vector.multi_reduction <add>, %45, %cst_21 [1, 2] : vector<1x8x256xf32> to vector<1xf32>
    %47 = vector.shape_cast %46 : vector<1xf32> to vector<1x1x1xf32>
    %48 = vector.extract %47[0, 0, 0] : f32 from vector<1x1x1xf32>
    %49 = arith.addf %37, %48 : f32
    %c1_22 = arith.constant 1 : index
    %50 = memref.load %arg9[%c1_22] : memref<16xf32, #tpu.memory_space<smem>>
    memref.store %49, %arg9[%c1_22] : memref<16xf32, #tpu.memory_space<smem>>
    %51 = tpu.iota {dimensions = array<i32: 1>} : vector<8x256xi32>
    %c16_i32 = arith.constant 16 : i32
    %c0_i32_23 = arith.constant 0 : i32
    %52 = arith.cmpi eq, %c16_i32, %c0_i32_23 : i32
    %c1_i32_24 = arith.constant 1 : i32
    %53 = arith.select %52, %c1_i32_24, %c16_i32 : i32
    %54 = vector.broadcast %53 : i32 to vector<8x256xi32>
    %55 = arith.remsi %51, %54 : vector<8x256xi32>
    %c0_i32_25 = arith.constant 0 : i32
    %56 = vector.broadcast %c0_i32_25 : i32 to vector<8x256xi32>
    %57 = arith.cmpi ne, %55, %56 : vector<8x256xi32>
    %c0_i32_26 = arith.constant 0 : i32
    %58 = vector.broadcast %c0_i32_26 : i32 to vector<8x256xi32>
    %59 = arith.cmpi slt, %55, %58 : vector<8x256xi32>
    %c0_i32_27 = arith.constant 0 : i32
    %60 = arith.cmpi slt, %53, %c0_i32_27 : i32
    %61 = vector.broadcast %60 : i1 to vector<8x256xi1>
    %62 = vector.broadcast %61 : vector<8x256xi1> to vector<8x256xi1>
    %63 = arith.xori %59, %62 : vector<8x256xi1>
    %64 = arith.andi %63, %57 : vector<8x256xi1>
    %65 = vector.broadcast %53 : i32 to vector<8x256xi32>
    %66 = arith.addi %55, %65 : vector<8x256xi32>
    %67 = arith.select %64, %66, %55 : vector<8x256xi1>, vector<8x256xi32>
    %c15_i32_28 = arith.constant 15 : i32
    %68 = vector.broadcast %c15_i32_28 : i32 to vector<8x256xi32>
    %69 = arith.cmpi ne, %67, %68 : vector<8x256xi32>
    %c240_i32 = arith.constant 240 : i32
    %70 = vector.broadcast %c240_i32 : i32 to vector<8x256xi32>
    %71 = arith.cmpi slt, %51, %70 : vector<8x256xi32>
    %72 = tpu.iota {dimensions = array<i32: 0>} : vector<8x1xi32>
    %c7_i32 = arith.constant 7 : i32
    %73 = vector.broadcast %c7_i32 : i32 to vector<8x1xi32>
    %74 = arith.cmpi slt, %72, %73 : vector<8x1xi32>
    %c0_i32_29 = arith.constant 0 : i32
    %c0_i32_30 = arith.constant 0 : i32
    %75 = tpu.memref_slice %arg6[%arg0, %2, %c0_i32_30] : memref<2x16x256xf32, #tpu.memory_space<any>> -> memref<1x1x256xf32, #tpu.memory_space<any>>
    %76 = tpu.memref_squeeze %75 : memref<1x1x256xf32, #tpu.memory_space<any>> -> memref<1x256xf32, #tpu.memory_space<any>>
    %77 = tpu.memref_slice %arg13[%c0_i32_29] : memref<3x!tpu.dma_semaphore, #tpu.memory_space<semaphore_mem>> -> memref<1x!tpu.dma_semaphore, #tpu.memory_space<semaphore_mem>>
    %78 = tpu.memref_squeeze %77 : memref<1x!tpu.dma_semaphore, #tpu.memory_space<semaphore_mem>> -> memref<!tpu.dma_semaphore, #tpu.memory_space<semaphore_mem>>
    tpu.wait_dma2 semaphore(%78 : memref<!tpu.dma_semaphore, #tpu.memory_space<semaphore_mem>>) src(%76 : memref<1x256xf32, #tpu.memory_space<any>>) dst(%arg10 : memref<1x256xf32, #tpu.memory_space<vmem>>)
    %c1_i32_31 = arith.constant 1 : i32
    %c0_i32_32 = arith.constant 0 : i32
    %79 = tpu.memref_slice %arg7[%arg0, %2, %c0_i32_32] : memref<2x16x256xf32, #tpu.memory_space<any>> -> memref<1x1x256xf32, #tpu.memory_space<any>>
    %80 = tpu.memref_squeeze %79 : memref<1x1x256xf32, #tpu.memory_space<any>> -> memref<1x256xf32, #tpu.memory_space<any>>
    %81 = tpu.memref_slice %arg13[%c1_i32_31] : memref<3x!tpu.dma_semaphore, #tpu.memory_space<semaphore_mem>> -> memref<1x!tpu.dma_semaphore, #tpu.memory_space<semaphore_mem>>
    %82 = tpu.memref_squeeze %81 : memref<1x!tpu.dma_semaphore, #tpu.memory_space<semaphore_mem>> -> memref<!tpu.dma_semaphore, #tpu.memory_space<semaphore_mem>>
    tpu.wait_dma2 semaphore(%82 : memref<!tpu.dma_semaphore, #tpu.memory_space<semaphore_mem>>) src(%80 : memref<1x256xf32, #tpu.memory_space<any>>) dst(%arg11 : memref<1x256xf32, #tpu.memory_space<vmem>>)
    %c2_i32_33 = arith.constant 2 : i32
    %c0_i32_34 = arith.constant 0 : i32
    %83 = tpu.memref_slice %arg8[%arg0, %2, %c0_i32_34] : memref<2x16x256xf32, #tpu.memory_space<any>> -> memref<1x1x256xf32, #tpu.memory_space<any>>
    %84 = tpu.memref_squeeze %83 : memref<1x1x256xf32, #tpu.memory_space<any>> -> memref<1x256xf32, #tpu.memory_space<any>>
    %85 = tpu.memref_slice %arg13[%c2_i32_33] : memref<3x!tpu.dma_semaphore, #tpu.memory_space<semaphore_mem>> -> memref<1x!tpu.dma_semaphore, #tpu.memory_space<semaphore_mem>>
    %86 = tpu.memref_squeeze %85 : memref<1x!tpu.dma_semaphore, #tpu.memory_space<semaphore_mem>> -> memref<!tpu.dma_semaphore, #tpu.memory_space<semaphore_mem>>
    tpu.wait_dma2 semaphore(%86 : memref<!tpu.dma_semaphore, #tpu.memory_space<semaphore_mem>>) src(%84 : memref<1x256xf32, #tpu.memory_space<any>>) dst(%arg12 : memref<1x256xf32, #tpu.memory_space<vmem>>)
    %c0_35 = arith.constant 0 : index
    %c0_36 = arith.constant 0 : index
    %87 = vector.load %arg12[%c0_35, %c0_36] : memref<1x256xf32, #tpu.memory_space<vmem>>, vector<1x256xf32>
    %c0_37 = arith.constant 0 : index
    %c0_38 = arith.constant 0 : index
    %88 = vector.load %arg10[%c0_37, %c0_38] : memref<1x256xf32, #tpu.memory_space<vmem>>, vector<1x256xf32>
    %89 = arith.mulf %88, %87 : vector<1x256xf32>
    %c0_39 = arith.constant 0 : index
    %c0_40 = arith.constant 0 : index
    %90 = vector.load %arg11[%c0_39, %c0_40] : memref<1x256xf32, #tpu.memory_space<vmem>>, vector<1x256xf32>
    %91 = arith.mulf %90, %87 : vector<1x256xf32>
    %92 = vector.extract_strided_slice %29 {offsets = [0, 1], sizes = [8, 255], strides = [1, 1]} : vector<8x256xf32> to vector<8x255xf32>
    %93 = vector.extract_strided_slice %29 {offsets = [0, 0], sizes = [8, 1], strides = [1, 1]} : vector<8x256xf32> to vector<8x1xf32>
    %94 = tpu.concatenate %92, %93 in 1 : vector<8x255xf32>, vector<8x1xf32> -> vector<8x256xf32>
    %95 = arith.subf %94, %29 : vector<8x256xf32>
    %cst_41 = arith.constant 0.000000e+00 : f32
    %96 = vector.broadcast %cst_41 : f32 to vector<8x256xf32>
    %97 = arith.select %69, %95, %96 : vector<8x256xi1>, vector<8x256xf32>
    %98 = arith.mulf %97, %21 : vector<8x256xf32>
    %c2 = arith.constant 2 : index
    %99 = memref.load %arg9[%c2] : memref<16xf32, #tpu.memory_space<smem>>
    %100 = vector.shape_cast %98 : vector<8x256xf32> to vector<1x8x256xf32>
    %cst_42 = arith.constant dense<0.000000e+00> : vector<1xf32>
    %101 = vector.multi_reduction <add>, %100, %cst_42 [1, 2] : vector<1x8x256xf32> to vector<1xf32>
    %102 = vector.shape_cast %101 : vector<1xf32> to vector<1x1x1xf32>
    %103 = vector.extract %102[0, 0, 0] : f32 from vector<1x1x1xf32>
    %104 = arith.addf %99, %103 : f32
    %c2_43 = arith.constant 2 : index
    %105 = memref.load %arg9[%c2_43] : memref<16xf32, #tpu.memory_space<smem>>
    memref.store %104, %arg9[%c2_43] : memref<16xf32, #tpu.memory_space<smem>>
    %c3 = arith.constant 3 : index
    %106 = memref.load %arg9[%c3] : memref<16xf32, #tpu.memory_space<smem>>
    %107 = arith.mulf %98, %97 : vector<8x256xf32>
    %108 = vector.shape_cast %107 : vector<8x256xf32> to vector<1x8x256xf32>
    %cst_44 = arith.constant dense<0.000000e+00> : vector<1xf32>
    %109 = vector.multi_reduction <add>, %108, %cst_44 [1, 2] : vector<1x8x256xf32> to vector<1xf32>
    %110 = vector.shape_cast %109 : vector<1xf32> to vector<1x1x1xf32>
    %111 = vector.extract %110[0, 0, 0] : f32 from vector<1x1x1xf32>
    %112 = arith.addf %106, %111 : f32
    %c3_45 = arith.constant 3 : index
    %113 = memref.load %arg9[%c3_45] : memref<16xf32, #tpu.memory_space<smem>>
    memref.store %112, %arg9[%c3_45] : memref<16xf32, #tpu.memory_space<smem>>
    %114 = vector.extract_strided_slice %26 {offsets = [0, 1], sizes = [8, 255], strides = [1, 1]} : vector<8x256xf32> to vector<8x255xf32>
    %115 = vector.extract_strided_slice %26 {offsets = [0, 0], sizes = [8, 1], strides = [1, 1]} : vector<8x256xf32> to vector<8x1xf32>
    %116 = tpu.concatenate %114, %115 in 1 : vector<8x255xf32>, vector<8x1xf32> -> vector<8x256xf32>
    %117 = arith.subf %116, %26 : vector<8x256xf32>
    %cst_46 = arith.constant 0.000000e+00 : f32
    %118 = vector.broadcast %cst_46 : f32 to vector<8x256xf32>
    %119 = arith.select %69, %117, %118 : vector<8x256xi1>, vector<8x256xf32>
    %120 = arith.mulf %119, %21 : vector<8x256xf32>
    %c8 = arith.constant 8 : index
    %121 = memref.load %arg9[%c8] : memref<16xf32, #tpu.memory_space<smem>>
    %122 = vector.shape_cast %120 : vector<8x256xf32> to vector<1x8x256xf32>
    %cst_47 = arith.constant dense<0.000000e+00> : vector<1xf32>
    %123 = vector.multi_reduction <add>, %122, %cst_47 [1, 2] : vector<1x8x256xf32> to vector<1xf32>
    %124 = vector.shape_cast %123 : vector<1xf32> to vector<1x1x1xf32>
    %125 = vector.extract %124[0, 0, 0] : f32 from vector<1x1x1xf32>
    %126 = arith.addf %121, %125 : f32
    %c8_48 = arith.constant 8 : index
    %127 = memref.load %arg9[%c8_48] : memref<16xf32, #tpu.memory_space<smem>>
    memref.store %126, %arg9[%c8_48] : memref<16xf32, #tpu.memory_space<smem>>
    %c9 = arith.constant 9 : index
    %128 = memref.load %arg9[%c9] : memref<16xf32, #tpu.memory_space<smem>>
    %129 = arith.mulf %120, %119 : vector<8x256xf32>
    %130 = vector.shape_cast %129 : vector<8x256xf32> to vector<1x8x256xf32>
    %cst_49 = arith.constant dense<0.000000e+00> : vector<1xf32>
    %131 = vector.multi_reduction <add>, %130, %cst_49 [1, 2] : vector<1x8x256xf32> to vector<1xf32>
    %132 = vector.shape_cast %131 : vector<1xf32> to vector<1x1x1xf32>
    %133 = vector.extract %132[0, 0, 0] : f32 from vector<1x1x1xf32>
    %134 = arith.addf %128, %133 : f32
    %c9_50 = arith.constant 9 : index
    %135 = memref.load %arg9[%c9_50] : memref<16xf32, #tpu.memory_space<smem>>
    memref.store %134, %arg9[%c9_50] : memref<16xf32, #tpu.memory_space<smem>>
    %136 = vector.extract_strided_slice %29 {offsets = [0, 16], sizes = [8, 240], strides = [1, 1]} : vector<8x256xf32> to vector<8x240xf32>
    %137 = vector.extract_strided_slice %29 {offsets = [0, 0], sizes = [8, 16], strides = [1, 1]} : vector<8x256xf32> to vector<8x16xf32>
    %138 = tpu.concatenate %136, %137 in 1 : vector<8x240xf32>, vector<8x16xf32> -> vector<8x256xf32>
    %139 = arith.subf %138, %29 : vector<8x256xf32>
    %cst_51 = arith.constant 0.000000e+00 : f32
    %140 = vector.broadcast %cst_51 : f32 to vector<8x256xf32>
    %141 = arith.select %71, %139, %140 : vector<8x256xi1>, vector<8x256xf32>
    %142 = arith.mulf %141, %21 : vector<8x256xf32>
    %c4 = arith.constant 4 : index
    %143 = memref.load %arg9[%c4] : memref<16xf32, #tpu.memory_space<smem>>
    %144 = vector.shape_cast %142 : vector<8x256xf32> to vector<1x8x256xf32>
    %cst_52 = arith.constant dense<0.000000e+00> : vector<1xf32>
    %145 = vector.multi_reduction <add>, %144, %cst_52 [1, 2] : vector<1x8x256xf32> to vector<1xf32>
    %146 = vector.shape_cast %145 : vector<1xf32> to vector<1x1x1xf32>
    %147 = vector.extract %146[0, 0, 0] : f32 from vector<1x1x1xf32>
    %148 = arith.addf %143, %147 : f32
    %c4_53 = arith.constant 4 : index
    %149 = memref.load %arg9[%c4_53] : memref<16xf32, #tpu.memory_space<smem>>
    memref.store %148, %arg9[%c4_53] : memref<16xf32, #tpu.memory_space<smem>>
    %c5 = arith.constant 5 : index
    %150 = memref.load %arg9[%c5] : memref<16xf32, #tpu.memory_space<smem>>
    %151 = arith.mulf %142, %141 : vector<8x256xf32>
    %152 = vector.shape_cast %151 : vector<8x256xf32> to vector<1x8x256xf32>
    %cst_54 = arith.constant dense<0.000000e+00> : vector<1xf32>
    %153 = vector.multi_reduction <add>, %152, %cst_54 [1, 2] : vector<1x8x256xf32> to vector<1xf32>
    %154 = vector.shape_cast %153 : vector<1xf32> to vector<1x1x1xf32>
    %155 = vector.extract %154[0, 0, 0] : f32 from vector<1x1x1xf32>
    %156 = arith.addf %150, %155 : f32
    %c5_55 = arith.constant 5 : index
    %157 = memref.load %arg9[%c5_55] : memref<16xf32, #tpu.memory_space<smem>>
    memref.store %156, %arg9[%c5_55] : memref<16xf32, #tpu.memory_space<smem>>
    %158 = vector.extract_strided_slice %26 {offsets = [0, 16], sizes = [8, 240], strides = [1, 1]} : vector<8x256xf32> to vector<8x240xf32>
    %159 = vector.extract_strided_slice %26 {offsets = [0, 0], sizes = [8, 16], strides = [1, 1]} : vector<8x256xf32> to vector<8x16xf32>
    %160 = tpu.concatenate %158, %159 in 1 : vector<8x240xf32>, vector<8x16xf32> -> vector<8x256xf32>
    %161 = arith.subf %160, %26 : vector<8x256xf32>
    %cst_56 = arith.constant 0.000000e+00 : f32
    %162 = vector.broadcast %cst_56 : f32 to vector<8x256xf32>
    %163 = arith.select %71, %161, %162 : vector<8x256xi1>, vector<8x256xf32>
    %164 = arith.mulf %163, %21 : vector<8x256xf32>
    %c10 = arith.constant 10 : index
    %165 = memref.load %arg9[%c10] : memref<16xf32, #tpu.memory_space<smem>>
    %166 = vector.shape_cast %164 : vector<8x256xf32> to vector<1x8x256xf32>
    %cst_57 = arith.constant dense<0.000000e+00> : vector<1xf32>
    %167 = vector.multi_reduction <add>, %166, %cst_57 [1, 2] : vector<1x8x256xf32> to vector<1xf32>
    %168 = vector.shape_cast %167 : vector<1xf32> to vector<1x1x1xf32>
    %169 = vector.extract %168[0, 0, 0] : f32 from vector<1x1x1xf32>
    %170 = arith.addf %165, %169 : f32
    %c10_58 = arith.constant 10 : index
    %171 = memref.load %arg9[%c10_58] : memref<16xf32, #tpu.memory_space<smem>>
    memref.store %170, %arg9[%c10_58] : memref<16xf32, #tpu.memory_space<smem>>
    %c11 = arith.constant 11 : index
    %172 = memref.load %arg9[%c11] : memref<16xf32, #tpu.memory_space<smem>>
    %173 = arith.mulf %164, %163 : vector<8x256xf32>
    %174 = vector.shape_cast %173 : vector<8x256xf32> to vector<1x8x256xf32>
    %cst_59 = arith.constant dense<0.000000e+00> : vector<1xf32>
    %175 = vector.multi_reduction <add>, %174, %cst_59 [1, 2] : vector<1x8x256xf32> to vector<1xf32>
    %176 = vector.shape_cast %175 : vector<1xf32> to vector<1x1x1xf32>
    %177 = vector.extract %176[0, 0, 0] : f32 from vector<1x1x1xf32>
    %178 = arith.addf %172, %177 : f32
    %c11_60 = arith.constant 11 : index
    %179 = memref.load %arg9[%c11_60] : memref<16xf32, #tpu.memory_space<smem>>
    memref.store %178, %arg9[%c11_60] : memref<16xf32, #tpu.memory_space<smem>>
    %180 = vector.extract_strided_slice %29 {offsets = [1, 0], sizes = [7, 256], strides = [1, 1]} : vector<8x256xf32> to vector<7x256xf32>
    %181 = vector.extract_strided_slice %29 {offsets = [0, 0], sizes = [1, 256], strides = [1, 1]} : vector<8x256xf32> to vector<1x256xf32>
    %182 = tpu.concatenate %180, %181 in 0 : vector<7x256xf32>, vector<1x256xf32> -> vector<8x256xf32>
    %183 = vector.shape_cast %74 : vector<8x1xi1> to vector<8x1xi1>
    %184 = vector.broadcast %183 : vector<8x1xi1> to vector<8x256xi1>
    %185 = vector.shape_cast %91 : vector<1x256xf32> to vector<1x256xf32>
    %186 = vector.broadcast %185 : vector<1x256xf32> to vector<8x256xf32>
    %187 = arith.select %184, %182, %186 : vector<8x256xi1>, vector<8x256xf32>
    %188 = arith.subf %187, %29 : vector<8x256xf32>
    %189 = arith.mulf %188, %21 : vector<8x256xf32>
    %c6 = arith.constant 6 : index
    %190 = memref.load %arg9[%c6] : memref<16xf32, #tpu.memory_space<smem>>
    %191 = vector.shape_cast %189 : vector<8x256xf32> to vector<1x8x256xf32>
    %cst_61 = arith.constant dense<0.000000e+00> : vector<1xf32>
    %192 = vector.multi_reduction <add>, %191, %cst_61 [1, 2] : vector<1x8x256xf32> to vector<1xf32>
    %193 = vector.shape_cast %192 : vector<1xf32> to vector<1x1x1xf32>
    %194 = vector.extract %193[0, 0, 0] : f32 from vector<1x1x1xf32>
    %195 = arith.addf %190, %194 : f32
    %c6_62 = arith.constant 6 : index
    %196 = memref.load %arg9[%c6_62] : memref<16xf32, #tpu.memory_space<smem>>
    memref.store %195, %arg9[%c6_62] : memref<16xf32, #tpu.memory_space<smem>>
    %c7 = arith.constant 7 : index
    %197 = memref.load %arg9[%c7] : memref<16xf32, #tpu.memory_space<smem>>
    %198 = arith.mulf %189, %188 : vector<8x256xf32>
    %199 = vector.shape_cast %198 : vector<8x256xf32> to vector<1x8x256xf32>
    %cst_63 = arith.constant dense<0.000000e+00> : vector<1xf32>
    %200 = vector.multi_reduction <add>, %199, %cst_63 [1, 2] : vector<1x8x256xf32> to vector<1xf32>
    %201 = vector.shape_cast %200 : vector<1xf32> to vector<1x1x1xf32>
    %202 = vector.extract %201[0, 0, 0] : f32 from vector<1x1x1xf32>
    %203 = arith.addf %197, %202 : f32
    %c7_64 = arith.constant 7 : index
    %204 = memref.load %arg9[%c7_64] : memref<16xf32, #tpu.memory_space<smem>>
    memref.store %203, %arg9[%c7_64] : memref<16xf32, #tpu.memory_space<smem>>
    %205 = vector.extract_strided_slice %26 {offsets = [1, 0], sizes = [7, 256], strides = [1, 1]} : vector<8x256xf32> to vector<7x256xf32>
    %206 = vector.extract_strided_slice %26 {offsets = [0, 0], sizes = [1, 256], strides = [1, 1]} : vector<8x256xf32> to vector<1x256xf32>
    %207 = tpu.concatenate %205, %206 in 0 : vector<7x256xf32>, vector<1x256xf32> -> vector<8x256xf32>
    %208 = vector.shape_cast %74 : vector<8x1xi1> to vector<8x1xi1>
    %209 = vector.broadcast %208 : vector<8x1xi1> to vector<8x256xi1>
    %210 = vector.shape_cast %89 : vector<1x256xf32> to vector<1x256xf32>
    %211 = vector.broadcast %210 : vector<1x256xf32> to vector<8x256xf32>
    %212 = arith.select %209, %207, %211 : vector<8x256xi1>, vector<8x256xf32>
    %213 = arith.subf %212, %26 : vector<8x256xf32>
    %214 = arith.mulf %213, %21 : vector<8x256xf32>
    %c12 = arith.constant 12 : index
    %215 = memref.load %arg9[%c12] : memref<16xf32, #tpu.memory_space<smem>>
    %216 = vector.shape_cast %214 : vector<8x256xf32> to vector<1x8x256xf32>
    %cst_65 = arith.constant dense<0.000000e+00> : vector<1xf32>
    %217 = vector.multi_reduction <add>, %216, %cst_65 [1, 2] : vector<1x8x256xf32> to vector<1xf32>
    %218 = vector.shape_cast %217 : vector<1xf32> to vector<1x1x1xf32>
    %219 = vector.extract %218[0, 0, 0] : f32 from vector<1x1x1xf32>
    %220 = arith.addf %215, %219 : f32
    %c12_66 = arith.constant 12 : index
    %221 = memref.load %arg9[%c12_66] : memref<16xf32, #tpu.memory_space<smem>>
    memref.store %220, %arg9[%c12_66] : memref<16xf32, #tpu.memory_space<smem>>
    %c13 = arith.constant 13 : index
    %222 = memref.load %arg9[%c13] : memref<16xf32, #tpu.memory_space<smem>>
    %223 = arith.mulf %214, %213 : vector<8x256xf32>
    %224 = vector.shape_cast %223 : vector<8x256xf32> to vector<1x8x256xf32>
    %cst_67 = arith.constant dense<0.000000e+00> : vector<1xf32>
    %225 = vector.multi_reduction <add>, %224, %cst_67 [1, 2] : vector<1x8x256xf32> to vector<1xf32>
    %226 = vector.shape_cast %225 : vector<1xf32> to vector<1x1x1xf32>
    %227 = vector.extract %226[0, 0, 0] : f32 from vector<1x1x1xf32>
    %228 = arith.addf %222, %227 : f32
    %c13_68 = arith.constant 13 : index
    %229 = memref.load %arg9[%c13_68] : memref<16xf32, #tpu.memory_space<smem>>
    memref.store %228, %arg9[%c13_68] : memref<16xf32, #tpu.memory_space<smem>>
    return
  }
  func.func @transform_0(%arg0: i32, %arg1: i32) -> (i32, i32, i32) {
    %c0_i32 = arith.constant 0 : i32
    %c0_i32_0 = arith.constant 0 : i32
    return %arg0, %arg1, %c0_i32 : i32, i32, i32
  }
  func.func @transform_1(%arg0: i32, %arg1: i32) -> (i32, i32, i32) {
    %c0_i32 = arith.constant 0 : i32
    %c0_i32_0 = arith.constant 0 : i32
    return %arg0, %arg1, %c0_i32 : i32, i32, i32
  }
  func.func @transform_2(%arg0: i32, %arg1: i32) -> (i32, i32, i32) {
    %c0_i32 = arith.constant 0 : i32
    %c0_i32_0 = arith.constant 0 : i32
    return %arg0, %arg1, %c0_i32 : i32, i32, i32
  }
  func.func @transform_3(%arg0: i32, %arg1: i32) -> (i32, i32, i32) {
    %c0_i32 = arith.constant 0 : i32
    %c0_i32_0 = arith.constant 0 : i32
    return %arg0, %arg1, %c0_i32 : i32, i32, i32
  }
  func.func @transform_7(%arg0: i32, %arg1: i32) -> i32 {
    %c0_i32 = arith.constant 0 : i32
    %c0_i32_0 = arith.constant 0 : i32
    return %c0_i32 : i32
  }
}

module attributes {stable_mosaic.version = 11 : i64} {
  func.func @_grad_kernel(%arg0: i32, %arg1: i32, %arg2: memref<16xf32, #tpu.memory_space<smem>>, %arg3: memref<1x8x256xf32, #tpu.memory_space<vmem>>, %arg4: memref<1x8x256xf32, #tpu.memory_space<vmem>>, %arg5: memref<1x8x256xf32, #tpu.memory_space<vmem>>, %arg6: memref<2x16x256xf32, #tpu.memory_space<any>>, %arg7: memref<2x16x256xf32, #tpu.memory_space<any>>, %arg8: memref<2x16x256xf32, #tpu.memory_space<any>>, %arg9: memref<8xf32, #tpu.memory_space<smem>>, %arg10: memref<1x256xf32, #tpu.memory_space<vmem>>, %arg11: memref<1x256xf32, #tpu.memory_space<vmem>>, %arg12: memref<1x256xf32, #tpu.memory_space<vmem>>, %arg13: memref<3x!tpu.dma_semaphore, #tpu.memory_space<semaphore_mem>>) attributes {dimension_semantics = [#tpu.dimension_semantics<arbitrary>, #tpu.dimension_semantics<arbitrary>], iteration_bounds = array<i64: 2, 2>, scalar_prefetch = 0 : i64, scratch_operands = 4 : i64, tpu.core_type = #tpu.core_type<tc>, window_params = [{transform_indices = @transform_0, window_bounds = array<i64: 16>}, {transform_indices = @transform_1, window_bounds = array<i64: 1, 8, 256>}, {transform_indices = @transform_2, window_bounds = array<i64: 1, 8, 256>}, {transform_indices = @transform_3, window_bounds = array<i64: 1, 8, 256>}, {}, {}, {}, {transform_indices = @transform_7, window_bounds = array<i64: 8>}]} {
    %c8_i32 = arith.constant 8 : i32
    %0 = arith.muli %arg1, %c8_i32 : i32
    %c8_i32_0 = arith.constant 8 : i32
    %1 = arith.addi %0, %c8_i32_0 : i32
    %c15_i32 = arith.constant 15 : i32
    %2 = arith.minsi %1, %c15_i32 : i32
    %c0_i32 = arith.constant 0 : i32
    %c0_i32_1 = arith.constant 0 : i32
    %3 = tpu.memref_slice %arg6[%arg0, %2, %c0_i32_1] : memref<2x16x256xf32, #tpu.memory_space<any>> -> memref<1x1x256xf32, #tpu.memory_space<any>>
    %4 = tpu.memref_squeeze %3 : memref<1x1x256xf32, #tpu.memory_space<any>> -> memref<1x256xf32, #tpu.memory_space<any>>
    %5 = tpu.memref_slice %arg13[%c0_i32] : memref<3x!tpu.dma_semaphore, #tpu.memory_space<semaphore_mem>> -> memref<1x!tpu.dma_semaphore, #tpu.memory_space<semaphore_mem>>
    %6 = tpu.memref_squeeze %5 : memref<1x!tpu.dma_semaphore, #tpu.memory_space<semaphore_mem>> -> memref<!tpu.dma_semaphore, #tpu.memory_space<semaphore_mem>>
    tpu.enqueue_dma source(%4 : memref<1x256xf32, #tpu.memory_space<any>>) target(%arg10 : memref<1x256xf32, #tpu.memory_space<vmem>>) target_semaphore(%6 : memref<!tpu.dma_semaphore, #tpu.memory_space<semaphore_mem>>)
    %c1_i32 = arith.constant 1 : i32
    %c0_i32_2 = arith.constant 0 : i32
    %7 = tpu.memref_slice %arg7[%arg0, %2, %c0_i32_2] : memref<2x16x256xf32, #tpu.memory_space<any>> -> memref<1x1x256xf32, #tpu.memory_space<any>>
    %8 = tpu.memref_squeeze %7 : memref<1x1x256xf32, #tpu.memory_space<any>> -> memref<1x256xf32, #tpu.memory_space<any>>
    %9 = tpu.memref_slice %arg13[%c1_i32] : memref<3x!tpu.dma_semaphore, #tpu.memory_space<semaphore_mem>> -> memref<1x!tpu.dma_semaphore, #tpu.memory_space<semaphore_mem>>
    %10 = tpu.memref_squeeze %9 : memref<1x!tpu.dma_semaphore, #tpu.memory_space<semaphore_mem>> -> memref<!tpu.dma_semaphore, #tpu.memory_space<semaphore_mem>>
    tpu.enqueue_dma source(%8 : memref<1x256xf32, #tpu.memory_space<any>>) target(%arg11 : memref<1x256xf32, #tpu.memory_space<vmem>>) target_semaphore(%10 : memref<!tpu.dma_semaphore, #tpu.memory_space<semaphore_mem>>)
    %c2_i32 = arith.constant 2 : i32
    %c0_i32_3 = arith.constant 0 : i32
    %11 = tpu.memref_slice %arg8[%arg0, %2, %c0_i32_3] : memref<2x16x256xf32, #tpu.memory_space<any>> -> memref<1x1x256xf32, #tpu.memory_space<any>>
    %12 = tpu.memref_squeeze %11 : memref<1x1x256xf32, #tpu.memory_space<any>> -> memref<1x256xf32, #tpu.memory_space<any>>
    %13 = tpu.memref_slice %arg13[%c2_i32] : memref<3x!tpu.dma_semaphore, #tpu.memory_space<semaphore_mem>> -> memref<1x!tpu.dma_semaphore, #tpu.memory_space<semaphore_mem>>
    %14 = tpu.memref_squeeze %13 : memref<1x!tpu.dma_semaphore, #tpu.memory_space<semaphore_mem>> -> memref<!tpu.dma_semaphore, #tpu.memory_space<semaphore_mem>>
    tpu.enqueue_dma source(%12 : memref<1x256xf32, #tpu.memory_space<any>>) target(%arg12 : memref<1x256xf32, #tpu.memory_space<vmem>>) target_semaphore(%14 : memref<!tpu.dma_semaphore, #tpu.memory_space<semaphore_mem>>)
    %c0_i32_4 = arith.constant 0 : i32
    %15 = arith.cmpi eq, %arg0, %c0_i32_4 : i32
    %c0_i32_5 = arith.constant 0 : i32
    %16 = arith.cmpi eq, %arg1, %c0_i32_5 : i32
    %17 = arith.andi %15, %16 : i1
    %18 = arith.extui %17 : i1 to i32
    %c0_i32_6 = arith.constant 0 : i32
    %19 = arith.cmpi ne, %18, %c0_i32_6 : i32
    scf.if %19 {
      %cst_43 = arith.constant 0.000000e+00 : f32
      %c0_44 = arith.constant 0 : index
      %180 = memref.load %arg9[%c0_44] : memref<8xf32, #tpu.memory_space<smem>>
      memref.store %cst_43, %arg9[%c0_44] : memref<8xf32, #tpu.memory_space<smem>>
      %cst_45 = arith.constant 0.000000e+00 : f32
      %c1_46 = arith.constant 1 : index
      %181 = memref.load %arg9[%c1_46] : memref<8xf32, #tpu.memory_space<smem>>
      memref.store %cst_45, %arg9[%c1_46] : memref<8xf32, #tpu.memory_space<smem>>
      %cst_47 = arith.constant 0.000000e+00 : f32
      %c2_48 = arith.constant 2 : index
      %182 = memref.load %arg9[%c2_48] : memref<8xf32, #tpu.memory_space<smem>>
      memref.store %cst_47, %arg9[%c2_48] : memref<8xf32, #tpu.memory_space<smem>>
      %cst_49 = arith.constant 0.000000e+00 : f32
      %c3_50 = arith.constant 3 : index
      %183 = memref.load %arg9[%c3_50] : memref<8xf32, #tpu.memory_space<smem>>
      memref.store %cst_49, %arg9[%c3_50] : memref<8xf32, #tpu.memory_space<smem>>
      %cst_51 = arith.constant 0.000000e+00 : f32
      %c4_52 = arith.constant 4 : index
      %184 = memref.load %arg9[%c4_52] : memref<8xf32, #tpu.memory_space<smem>>
      memref.store %cst_51, %arg9[%c4_52] : memref<8xf32, #tpu.memory_space<smem>>
      %cst_53 = arith.constant 0.000000e+00 : f32
      %c5_54 = arith.constant 5 : index
      %185 = memref.load %arg9[%c5_54] : memref<8xf32, #tpu.memory_space<smem>>
      memref.store %cst_53, %arg9[%c5_54] : memref<8xf32, #tpu.memory_space<smem>>
      %cst_55 = arith.constant 0.000000e+00 : f32
      %c6_56 = arith.constant 6 : index
      %186 = memref.load %arg9[%c6_56] : memref<8xf32, #tpu.memory_space<smem>>
      memref.store %cst_55, %arg9[%c6_56] : memref<8xf32, #tpu.memory_space<smem>>
      %cst_57 = arith.constant 0.000000e+00 : f32
      %c7_58 = arith.constant 7 : index
      %187 = memref.load %arg9[%c7_58] : memref<8xf32, #tpu.memory_space<smem>>
      memref.store %cst_57, %arg9[%c7_58] : memref<8xf32, #tpu.memory_space<smem>>
    } else {
    }
    %c0 = arith.constant 0 : index
    %c0_7 = arith.constant 0 : index
    %c0_8 = arith.constant 0 : index
    %20 = vector.load %arg5[%c0, %c0_7, %c0_8] : memref<1x8x256xf32, #tpu.memory_space<vmem>>, vector<1x8x256xf32>
    %21 = vector.shape_cast %20 : vector<1x8x256xf32> to vector<8x256xf32>
    %c0_9 = arith.constant 0 : index
    %c0_10 = arith.constant 0 : index
    %c0_11 = arith.constant 0 : index
    %22 = vector.load %arg3[%c0_9, %c0_10, %c0_11] : memref<1x8x256xf32, #tpu.memory_space<vmem>>, vector<1x8x256xf32>
    %23 = vector.shape_cast %22 : vector<1x8x256xf32> to vector<8x256xf32>
    %24 = arith.mulf %23, %21 : vector<8x256xf32>
    %c0_12 = arith.constant 0 : index
    %c0_13 = arith.constant 0 : index
    %c0_14 = arith.constant 0 : index
    %25 = vector.load %arg4[%c0_12, %c0_13, %c0_14] : memref<1x8x256xf32, #tpu.memory_space<vmem>>, vector<1x8x256xf32>
    %26 = vector.shape_cast %25 : vector<1x8x256xf32> to vector<8x256xf32>
    %27 = arith.mulf %26, %21 : vector<8x256xf32>
    %28 = tpu.iota {dimensions = array<i32: 1>} : vector<8x256xi32>
    %c16_i32 = arith.constant 16 : i32
    %c0_i32_15 = arith.constant 0 : i32
    %29 = arith.cmpi eq, %c16_i32, %c0_i32_15 : i32
    %c1_i32_16 = arith.constant 1 : i32
    %30 = arith.select %29, %c1_i32_16, %c16_i32 : i32
    %31 = vector.broadcast %30 : i32 to vector<8x256xi32>
    %32 = arith.remsi %28, %31 : vector<8x256xi32>
    %c0_i32_17 = arith.constant 0 : i32
    %33 = vector.broadcast %c0_i32_17 : i32 to vector<8x256xi32>
    %34 = arith.cmpi ne, %32, %33 : vector<8x256xi32>
    %c0_i32_18 = arith.constant 0 : i32
    %35 = vector.broadcast %c0_i32_18 : i32 to vector<8x256xi32>
    %36 = arith.cmpi slt, %32, %35 : vector<8x256xi32>
    %c0_i32_19 = arith.constant 0 : i32
    %37 = arith.cmpi slt, %30, %c0_i32_19 : i32
    %38 = vector.broadcast %37 : i1 to vector<8x256xi1>
    %39 = vector.broadcast %38 : vector<8x256xi1> to vector<8x256xi1>
    %40 = arith.xori %36, %39 : vector<8x256xi1>
    %41 = arith.andi %40, %34 : vector<8x256xi1>
    %42 = vector.broadcast %30 : i32 to vector<8x256xi32>
    %43 = arith.addi %32, %42 : vector<8x256xi32>
    %44 = arith.select %41, %43, %32 : vector<8x256xi1>, vector<8x256xi32>
    %c15_i32_20 = arith.constant 15 : i32
    %45 = vector.broadcast %c15_i32_20 : i32 to vector<8x256xi32>
    %46 = arith.cmpi ne, %44, %45 : vector<8x256xi32>
    %c240_i32 = arith.constant 240 : i32
    %47 = vector.broadcast %c240_i32 : i32 to vector<8x256xi32>
    %48 = arith.cmpi slt, %28, %47 : vector<8x256xi32>
    %49 = tpu.iota {dimensions = array<i32: 0>} : vector<8x1xi32>
    %c7_i32 = arith.constant 7 : i32
    %50 = vector.broadcast %c7_i32 : i32 to vector<8x1xi32>
    %51 = arith.cmpi slt, %49, %50 : vector<8x1xi32>
    %c0_i32_21 = arith.constant 0 : i32
    %c0_i32_22 = arith.constant 0 : i32
    %52 = tpu.memref_slice %arg6[%arg0, %2, %c0_i32_22] : memref<2x16x256xf32, #tpu.memory_space<any>> -> memref<1x1x256xf32, #tpu.memory_space<any>>
    %53 = tpu.memref_squeeze %52 : memref<1x1x256xf32, #tpu.memory_space<any>> -> memref<1x256xf32, #tpu.memory_space<any>>
    %54 = tpu.memref_slice %arg13[%c0_i32_21] : memref<3x!tpu.dma_semaphore, #tpu.memory_space<semaphore_mem>> -> memref<1x!tpu.dma_semaphore, #tpu.memory_space<semaphore_mem>>
    %55 = tpu.memref_squeeze %54 : memref<1x!tpu.dma_semaphore, #tpu.memory_space<semaphore_mem>> -> memref<!tpu.dma_semaphore, #tpu.memory_space<semaphore_mem>>
    tpu.wait_dma2 semaphore(%55 : memref<!tpu.dma_semaphore, #tpu.memory_space<semaphore_mem>>) src(%53 : memref<1x256xf32, #tpu.memory_space<any>>) dst(%arg10 : memref<1x256xf32, #tpu.memory_space<vmem>>)
    %c1_i32_23 = arith.constant 1 : i32
    %c0_i32_24 = arith.constant 0 : i32
    %56 = tpu.memref_slice %arg7[%arg0, %2, %c0_i32_24] : memref<2x16x256xf32, #tpu.memory_space<any>> -> memref<1x1x256xf32, #tpu.memory_space<any>>
    %57 = tpu.memref_squeeze %56 : memref<1x1x256xf32, #tpu.memory_space<any>> -> memref<1x256xf32, #tpu.memory_space<any>>
    %58 = tpu.memref_slice %arg13[%c1_i32_23] : memref<3x!tpu.dma_semaphore, #tpu.memory_space<semaphore_mem>> -> memref<1x!tpu.dma_semaphore, #tpu.memory_space<semaphore_mem>>
    %59 = tpu.memref_squeeze %58 : memref<1x!tpu.dma_semaphore, #tpu.memory_space<semaphore_mem>> -> memref<!tpu.dma_semaphore, #tpu.memory_space<semaphore_mem>>
    tpu.wait_dma2 semaphore(%59 : memref<!tpu.dma_semaphore, #tpu.memory_space<semaphore_mem>>) src(%57 : memref<1x256xf32, #tpu.memory_space<any>>) dst(%arg11 : memref<1x256xf32, #tpu.memory_space<vmem>>)
    %c2_i32_25 = arith.constant 2 : i32
    %c0_i32_26 = arith.constant 0 : i32
    %60 = tpu.memref_slice %arg8[%arg0, %2, %c0_i32_26] : memref<2x16x256xf32, #tpu.memory_space<any>> -> memref<1x1x256xf32, #tpu.memory_space<any>>
    %61 = tpu.memref_squeeze %60 : memref<1x1x256xf32, #tpu.memory_space<any>> -> memref<1x256xf32, #tpu.memory_space<any>>
    %62 = tpu.memref_slice %arg13[%c2_i32_25] : memref<3x!tpu.dma_semaphore, #tpu.memory_space<semaphore_mem>> -> memref<1x!tpu.dma_semaphore, #tpu.memory_space<semaphore_mem>>
    %63 = tpu.memref_squeeze %62 : memref<1x!tpu.dma_semaphore, #tpu.memory_space<semaphore_mem>> -> memref<!tpu.dma_semaphore, #tpu.memory_space<semaphore_mem>>
    tpu.wait_dma2 semaphore(%63 : memref<!tpu.dma_semaphore, #tpu.memory_space<semaphore_mem>>) src(%61 : memref<1x256xf32, #tpu.memory_space<any>>) dst(%arg12 : memref<1x256xf32, #tpu.memory_space<vmem>>)
    %c0_27 = arith.constant 0 : index
    %c0_28 = arith.constant 0 : index
    %64 = vector.load %arg12[%c0_27, %c0_28] : memref<1x256xf32, #tpu.memory_space<vmem>>, vector<1x256xf32>
    %c0_29 = arith.constant 0 : index
    %c0_30 = arith.constant 0 : index
    %65 = vector.load %arg10[%c0_29, %c0_30] : memref<1x256xf32, #tpu.memory_space<vmem>>, vector<1x256xf32>
    %66 = arith.mulf %65, %64 : vector<1x256xf32>
    %c0_31 = arith.constant 0 : index
    %c0_32 = arith.constant 0 : index
    %67 = vector.load %arg11[%c0_31, %c0_32] : memref<1x256xf32, #tpu.memory_space<vmem>>, vector<1x256xf32>
    %68 = arith.mulf %67, %64 : vector<1x256xf32>
    %69 = vector.extract_strided_slice %27 {offsets = [0, 1], sizes = [8, 255], strides = [1, 1]} : vector<8x256xf32> to vector<8x255xf32>
    %70 = vector.extract_strided_slice %27 {offsets = [0, 0], sizes = [8, 1], strides = [1, 1]} : vector<8x256xf32> to vector<8x1xf32>
    %71 = tpu.concatenate %69, %70 in 1 : vector<8x255xf32>, vector<8x1xf32> -> vector<8x256xf32>
    %72 = arith.subf %71, %27 : vector<8x256xf32>
    %cst = arith.constant 0.000000e+00 : f32
    %73 = vector.broadcast %cst : f32 to vector<8x256xf32>
    %74 = arith.select %46, %72, %73 : vector<8x256xi1>, vector<8x256xf32>
    %c0_33 = arith.constant 0 : index
    %75 = memref.load %arg2[%c0_33] : memref<16xf32, #tpu.memory_space<smem>>
    %76 = vector.broadcast %75 : f32 to vector<8x256xf32>
    %77 = arith.subf %74, %76 : vector<8x256xf32>
    %c1 = arith.constant 1 : index
    %78 = memref.load %arg2[%c1] : memref<16xf32, #tpu.memory_space<smem>>
    %79 = vector.broadcast %78 : f32 to vector<8x256xf32>
    %80 = arith.mulf %77, %79 : vector<8x256xf32>
    %81 = math.absf %80 : vector<8x256xf32>
    %82 = vector.extract_strided_slice %24 {offsets = [0, 1], sizes = [8, 255], strides = [1, 1]} : vector<8x256xf32> to vector<8x255xf32>
    %83 = vector.extract_strided_slice %24 {offsets = [0, 0], sizes = [8, 1], strides = [1, 1]} : vector<8x256xf32> to vector<8x1xf32>
    %84 = tpu.concatenate %82, %83 in 1 : vector<8x255xf32>, vector<8x1xf32> -> vector<8x256xf32>
    %85 = arith.subf %84, %24 : vector<8x256xf32>
    %cst_34 = arith.constant 0.000000e+00 : f32
    %86 = vector.broadcast %cst_34 : f32 to vector<8x256xf32>
    %87 = arith.select %46, %85, %86 : vector<8x256xi1>, vector<8x256xf32>
    %c6 = arith.constant 6 : index
    %88 = memref.load %arg2[%c6] : memref<16xf32, #tpu.memory_space<smem>>
    %89 = vector.broadcast %88 : f32 to vector<8x256xf32>
    %90 = arith.subf %87, %89 : vector<8x256xf32>
    %c7 = arith.constant 7 : index
    %91 = memref.load %arg2[%c7] : memref<16xf32, #tpu.memory_space<smem>>
    %92 = vector.broadcast %91 : f32 to vector<8x256xf32>
    %93 = arith.mulf %90, %92 : vector<8x256xf32>
    %94 = math.absf %93 : vector<8x256xf32>
    %95 = arith.subf %94, %81 : vector<8x256xf32>
    %96 = math.absf %95 : vector<8x256xf32>
    %97 = arith.mulf %96, %21 : vector<8x256xf32>
    %98 = vector.shape_cast %97 : vector<8x256xf32> to vector<1x8x256xf32>
    %cst_35 = arith.constant dense<0.000000e+00> : vector<1xf32>
    %99 = vector.multi_reduction <add>, %98, %cst_35 [1, 2] : vector<1x8x256xf32> to vector<1xf32>
    %100 = vector.shape_cast %99 : vector<1xf32> to vector<1x1x1xf32>
    %101 = vector.extract %100[0, 0, 0] : f32 from vector<1x1x1xf32>
    %cst_36 = arith.constant 0.000000e+00 : f32
    %102 = arith.addf %cst_36, %101 : f32
    %103 = vector.extract_strided_slice %27 {offsets = [0, 16], sizes = [8, 240], strides = [1, 1]} : vector<8x256xf32> to vector<8x240xf32>
    %104 = vector.extract_strided_slice %27 {offsets = [0, 0], sizes = [8, 16], strides = [1, 1]} : vector<8x256xf32> to vector<8x16xf32>
    %105 = tpu.concatenate %103, %104 in 1 : vector<8x240xf32>, vector<8x16xf32> -> vector<8x256xf32>
    %106 = arith.subf %105, %27 : vector<8x256xf32>
    %cst_37 = arith.constant 0.000000e+00 : f32
    %107 = vector.broadcast %cst_37 : f32 to vector<8x256xf32>
    %108 = arith.select %48, %106, %107 : vector<8x256xi1>, vector<8x256xf32>
    %c2 = arith.constant 2 : index
    %109 = memref.load %arg2[%c2] : memref<16xf32, #tpu.memory_space<smem>>
    %110 = vector.broadcast %109 : f32 to vector<8x256xf32>
    %111 = arith.subf %108, %110 : vector<8x256xf32>
    %c3 = arith.constant 3 : index
    %112 = memref.load %arg2[%c3] : memref<16xf32, #tpu.memory_space<smem>>
    %113 = vector.broadcast %112 : f32 to vector<8x256xf32>
    %114 = arith.mulf %111, %113 : vector<8x256xf32>
    %115 = math.absf %114 : vector<8x256xf32>
    %116 = vector.extract_strided_slice %24 {offsets = [0, 16], sizes = [8, 240], strides = [1, 1]} : vector<8x256xf32> to vector<8x240xf32>
    %117 = vector.extract_strided_slice %24 {offsets = [0, 0], sizes = [8, 16], strides = [1, 1]} : vector<8x256xf32> to vector<8x16xf32>
    %118 = tpu.concatenate %116, %117 in 1 : vector<8x240xf32>, vector<8x16xf32> -> vector<8x256xf32>
    %119 = arith.subf %118, %24 : vector<8x256xf32>
    %cst_38 = arith.constant 0.000000e+00 : f32
    %120 = vector.broadcast %cst_38 : f32 to vector<8x256xf32>
    %121 = arith.select %48, %119, %120 : vector<8x256xi1>, vector<8x256xf32>
    %c8 = arith.constant 8 : index
    %122 = memref.load %arg2[%c8] : memref<16xf32, #tpu.memory_space<smem>>
    %123 = vector.broadcast %122 : f32 to vector<8x256xf32>
    %124 = arith.subf %121, %123 : vector<8x256xf32>
    %c9 = arith.constant 9 : index
    %125 = memref.load %arg2[%c9] : memref<16xf32, #tpu.memory_space<smem>>
    %126 = vector.broadcast %125 : f32 to vector<8x256xf32>
    %127 = arith.mulf %124, %126 : vector<8x256xf32>
    %128 = math.absf %127 : vector<8x256xf32>
    %129 = arith.subf %128, %115 : vector<8x256xf32>
    %130 = math.absf %129 : vector<8x256xf32>
    %131 = arith.mulf %130, %21 : vector<8x256xf32>
    %132 = vector.shape_cast %131 : vector<8x256xf32> to vector<1x8x256xf32>
    %cst_39 = arith.constant dense<0.000000e+00> : vector<1xf32>
    %133 = vector.multi_reduction <add>, %132, %cst_39 [1, 2] : vector<1x8x256xf32> to vector<1xf32>
    %134 = vector.shape_cast %133 : vector<1xf32> to vector<1x1x1xf32>
    %135 = vector.extract %134[0, 0, 0] : f32 from vector<1x1x1xf32>
    %136 = arith.addf %102, %135 : f32
    %137 = vector.extract_strided_slice %27 {offsets = [1, 0], sizes = [7, 256], strides = [1, 1]} : vector<8x256xf32> to vector<7x256xf32>
    %138 = vector.extract_strided_slice %27 {offsets = [0, 0], sizes = [1, 256], strides = [1, 1]} : vector<8x256xf32> to vector<1x256xf32>
    %139 = tpu.concatenate %137, %138 in 0 : vector<7x256xf32>, vector<1x256xf32> -> vector<8x256xf32>
    %140 = vector.shape_cast %51 : vector<8x1xi1> to vector<8x1xi1>
    %141 = vector.broadcast %140 : vector<8x1xi1> to vector<8x256xi1>
    %142 = vector.shape_cast %68 : vector<1x256xf32> to vector<1x256xf32>
    %143 = vector.broadcast %142 : vector<1x256xf32> to vector<8x256xf32>
    %144 = arith.select %141, %139, %143 : vector<8x256xi1>, vector<8x256xf32>
    %145 = arith.subf %144, %27 : vector<8x256xf32>
    %c4 = arith.constant 4 : index
    %146 = memref.load %arg2[%c4] : memref<16xf32, #tpu.memory_space<smem>>
    %147 = vector.broadcast %146 : f32 to vector<8x256xf32>
    %148 = arith.subf %145, %147 : vector<8x256xf32>
    %c5 = arith.constant 5 : index
    %149 = memref.load %arg2[%c5] : memref<16xf32, #tpu.memory_space<smem>>
    %150 = vector.broadcast %149 : f32 to vector<8x256xf32>
    %151 = arith.mulf %148, %150 : vector<8x256xf32>
    %152 = math.absf %151 : vector<8x256xf32>
    %153 = vector.extract_strided_slice %24 {offsets = [1, 0], sizes = [7, 256], strides = [1, 1]} : vector<8x256xf32> to vector<7x256xf32>
    %154 = vector.extract_strided_slice %24 {offsets = [0, 0], sizes = [1, 256], strides = [1, 1]} : vector<8x256xf32> to vector<1x256xf32>
    %155 = tpu.concatenate %153, %154 in 0 : vector<7x256xf32>, vector<1x256xf32> -> vector<8x256xf32>
    %156 = vector.shape_cast %51 : vector<8x1xi1> to vector<8x1xi1>
    %157 = vector.broadcast %156 : vector<8x1xi1> to vector<8x256xi1>
    %158 = vector.shape_cast %66 : vector<1x256xf32> to vector<1x256xf32>
    %159 = vector.broadcast %158 : vector<1x256xf32> to vector<8x256xf32>
    %160 = arith.select %157, %155, %159 : vector<8x256xi1>, vector<8x256xf32>
    %161 = arith.subf %160, %24 : vector<8x256xf32>
    %c10 = arith.constant 10 : index
    %162 = memref.load %arg2[%c10] : memref<16xf32, #tpu.memory_space<smem>>
    %163 = vector.broadcast %162 : f32 to vector<8x256xf32>
    %164 = arith.subf %161, %163 : vector<8x256xf32>
    %c11 = arith.constant 11 : index
    %165 = memref.load %arg2[%c11] : memref<16xf32, #tpu.memory_space<smem>>
    %166 = vector.broadcast %165 : f32 to vector<8x256xf32>
    %167 = arith.mulf %164, %166 : vector<8x256xf32>
    %168 = math.absf %167 : vector<8x256xf32>
    %169 = arith.subf %168, %152 : vector<8x256xf32>
    %170 = math.absf %169 : vector<8x256xf32>
    %171 = arith.mulf %170, %21 : vector<8x256xf32>
    %172 = vector.shape_cast %171 : vector<8x256xf32> to vector<1x8x256xf32>
    %cst_40 = arith.constant dense<0.000000e+00> : vector<1xf32>
    %173 = vector.multi_reduction <add>, %172, %cst_40 [1, 2] : vector<1x8x256xf32> to vector<1xf32>
    %174 = vector.shape_cast %173 : vector<1xf32> to vector<1x1x1xf32>
    %175 = vector.extract %174[0, 0, 0] : f32 from vector<1x1x1xf32>
    %176 = arith.addf %136, %175 : f32
    %c0_41 = arith.constant 0 : index
    %177 = memref.load %arg9[%c0_41] : memref<8xf32, #tpu.memory_space<smem>>
    %178 = arith.addf %177, %176 : f32
    %c0_42 = arith.constant 0 : index
    %179 = memref.load %arg9[%c0_42] : memref<8xf32, #tpu.memory_space<smem>>
    memref.store %178, %arg9[%c0_42] : memref<8xf32, #tpu.memory_space<smem>>
    return
  }
  func.func @transform_0(%arg0: i32, %arg1: i32) -> i32 {
    %c0_i32 = arith.constant 0 : i32
    %c0_i32_0 = arith.constant 0 : i32
    return %c0_i32 : i32
  }
  func.func @transform_1(%arg0: i32, %arg1: i32) -> (i32, i32, i32) {
    %c0_i32 = arith.constant 0 : i32
    %c0_i32_0 = arith.constant 0 : i32
    return %arg0, %arg1, %c0_i32 : i32, i32, i32
  }
  func.func @transform_2(%arg0: i32, %arg1: i32) -> (i32, i32, i32) {
    %c0_i32 = arith.constant 0 : i32
    %c0_i32_0 = arith.constant 0 : i32
    return %arg0, %arg1, %c0_i32 : i32, i32, i32
  }
  func.func @transform_3(%arg0: i32, %arg1: i32) -> (i32, i32, i32) {
    %c0_i32 = arith.constant 0 : i32
    %c0_i32_0 = arith.constant 0 : i32
    return %arg0, %arg1, %c0_i32 : i32, i32, i32
  }
  func.func @transform_7(%arg0: i32, %arg1: i32) -> i32 {
    %c0_i32 = arith.constant 0 : i32
    %c0_i32_0 = arith.constant 0 : i32
    return %c0_i32 : i32
  }
}

</mosaic_0001>

<bundles_post_ra>
// kernel: net_loss.2
= control target key start
LH: loop header
LB: loop body
LE: loop exit
PB: predicated region body
PF: predicated region fallthrough
CT: control target
= control target key end

     0   :  { %s1588_s0 = inlined_call_operand.vmem [shape: f32[2,16,256], index: 0, kind: input, shape index: {}]   ;;  %s1589_s1 = inlined_call_operand.vmem [shape: f32[2,16,256], index: 1, kind: input, shape index: {}, may-alias: {1,4}]   ;;  %s1590_s2 = inlined_call_operand.vmem [shape: f32[2,16,256], index: 2, kind: input, shape index: {}, may-alias: {2,5}]   ;;  %s1591_s3 = inlined_call_operand.vmem [shape: f32[2,16,256], index: 3, kind: input, shape index: {}, may-alias: {3,6}]   ;;  %s1592_s4 = inlined_call_operand.vmem [shape: f32[2,16,256], index: 4, kind: input, shape index: {}, may-alias: {1,4}]   ;;  %s1593_s5 = inlined_call_operand.vmem [shape: f32[2,16,256], index: 5, kind: input, shape index: {}, may-alias: {2,5}]   ;;  %s1594_s6 = inlined_call_operand.vmem [shape: f32[2,16,256], index: 6, kind: input, shape index: {}, may-alias: {3,6}]   ;;  %s1595_s7 = inlined_call_operand.vmem [shape: f32[16], index: 7, kind: output, shape index: {}]  }
   0x1   :  { %1597 = sst [smem:[#allocation18_spill]] %s1588_s0 }
   0x2   :  { %1598 = sst [smem:[#allocation19_spill]] %s1589_s1 }
   0x3   :  { %12 = vsyncpa [#allocation7], 0  ;;  %s1343_s24 = smov 0   ;;  %s1345_s25 = smov 0  }
   0x4   :  { %s1347_s26 = smov 0   ;;  %s1349_s27 = smov 0  }
   0x5   :  { %s1351_s28 = smov 0  }
   0x6 LB: > { %1599 = sst [smem:[#allocation15_spill]] %s1293_s27  ;;  %s27_s30 = sadd.s32 1, %s1289_s26  ;;  %s1297_s28 = sphi %s1351_s28, %s18_s28   ;;  %s1293_s27 = sphi %s1349_s27, %s1613_s27   ;;  %s1289_s26 = sphi %s1347_s26, %s1615_s26   ;;  %s1285_s25 = sphi %s1345_s25, %s1611_s25   ;;  %s1281_s24 = sphi %s1343_s24, %s1614_s24  }
   0x7   : > { %p28_p0 = scmp.ge.s32.totalorder %s27_s30, 2  ;;  %s30_s8 = sadd.s32 1, %s1293_s27 }
   0x8   : > { %p1104_p1 = scmp.ge.s32.totalorder %s1297_s28, 1  ;;  %p227_p2 = scmp.lt.s32.totalorder %s1297_s28, 5 }
   0x9   : > { %s1617_s30 = smov (%p28_p0, %s27_s30), 0  ;;  %s1619_s8 = smov (!%p28_p0, %s30_s8), %s1293_s27 }
   0xa   : > { %1600 = sst [smem:[#allocation16_spill]] %s1617_s30  ;;  %p228_p3 = pnand %p1104_p1, %p227_p2 }
   0xb   : > { %p32_p4 = scmp.ge.s32.totalorder %s1619_s8, 2  ;;  %p279_p5 = scmp.lt.s32.totalorder (!%p228_p3), %s1285_s25, 1 }
   0xc   : > { %231 = sbr.rel (%p228_p3) target bundleno = 639 (0x27f), region = 36  ;;  %p281_p6 = scmp.lt.s32.totalorder (!%p228_p3), %s1281_s24, 1 }
   0xd   : > { %s1621_s8 = smov (%p32_p4, %s1619_s8), 0  ;;  %s1117_s9 = sshll.u32 (!%p228_p3), %s1281_s24, 3 }
   0xe   : > { %1601 = sst [smem:[#allocation17_spill]] %s1621_s8  ;;  %s316_s13 = sadd.s32 (!%p228_p3), 8, %s1117_s9 }
   0xf   : > { %p317_p7 = scmp.lt.s32.totalorder (!%p228_p3), %s316_s13, 15  ;;  %s1602_s0 = sld [smem:[#allocation18_spill]] (!%p228_p3) }
  0x10   : > { %s1603_s1 = sld [smem:[#allocation19_spill]] (!%p228_p3) }
  0x13   : > { %s280_s10 = scalar_select %p279_p5, %s1285_s25, 1 }
  0x14   : > { %s282_s11 = scalar_select %p281_p6, %s1281_s24, 1 }
  0x15   : > { %s1106_s12 = sshll.u32 %s280_s10, 2  ;;  %s1623_s13 = smov (!%p317_p7, %s316_s13), 15 }
  0x16   : > { %s1105_s14 = sshll.u32 %s282_s11, 1 }
  0x17   : > { %s285_s15 = sadd.s32 %s1106_s12, %s1105_s14  ;;  %s1119_s12 = sshll.u32 %s1285_s25, 5 }
  0x18   : > { %s1107_s16 = sshll.u32 %s285_s15, 3  ;;  %s319_s14 = sshrl.u32 %s1623_s13, 3 }
  0x19   : > { %s1386_s19 = scalar_lea.vmem %s1602_s0, %s1107_s16  ;;  %s296_s22 = scalar_lea.vmem %s1603_s1, %s1107_s16 }
  0x1a   : > { %s1394_s8 = scalar_lea.vmem %s1590_s2, %s1107_s16  ;;  %s314_s11 = scalar_lea.vmem %s1591_s3, %s1107_s16 }
  0x1b   : > { %s320_s15 = sand.u32 7, %s1623_s13   ;;  %s1118_s17 = sshll.u32 %s319_s14, 4 }
  0x1c   : > { %s322_s18 = sadd.s32 %s1118_s17, %s320_s15 }
  0x1d   : > { %s324_s0 = sadd.s32 %s1119_s12, %s322_s18 }
  0x1e   : > { %s325_s20 = scalar_lea.vmem %s1592_s4, %s324_s0 }
  0x1f   : > { %v343_v0 = vld [vmem:[%s325_s20] sm:$0x1]  ;;  %v345_v1 = vld [vmem:[%s325_s20 + $0x8] sm:$0x1] }
  0x20   : > { %344 = vst [vmem:[#allocation2] sm:$0x1] %v343_v0  ;;  %346 = vst [vmem:[#allocation2 + $0x1] sm:$0x1] %v345_v1 }
  0x21   : > { %373 = vsyncadd [#allocation5], 32  ;;  %s374_s16 = scalar_lea.vmem %s1593_s5, %s324_s0 }
  0x22   : > { %v393_v2 = vld [vmem:[%s374_s16] sm:$0x1]  ;;  %v395_v3 = vld [vmem:[%s374_s16 + $0x8] sm:$0x1] }
  0x23   : > { %394 = vst [vmem:[#allocation3] sm:$0x1] %v393_v2  ;;  %396 = vst [vmem:[#allocation3 + $0x1] sm:$0x1] %v395_v3 }
  0x24   : > { %423 = vsyncadd [#allocation5 + $0x1], 32  ;;  %s424_s27 = scalar_lea.vmem %s1594_s6, %s324_s0  ;;  %v1409_v6 = vld [vmem:[%s314_s11] sm:$0xff]  ;;  %v1411_v7 = vld [vmem:[%s314_s11 + $0x8] sm:$0xff] }
  0x25   : > { %v443_v4 = vld [vmem:[%s424_s27] sm:$0x1]  ;;  %v445_v5 = vld [vmem:[%s424_s27 + $0x8] sm:$0x1]  ;;  %v525_v12 = vadd.f32 %v1411_v7, %v1409_v6 }
  0x26   : > { %444 = vst [vmem:[#allocation4] sm:$0x1] %v443_v4  ;;  %446 = vst [vmem:[#allocation4 + $0x1] sm:$0x1] %v445_v5  ;;  %v516_v8 = vld [vmem:[%s296_s22] sm:$0xff]  ;;  %v517_v9 = vld [vmem:[%s296_s22 + $0x8] sm:$0xff] }
  0x27   : > { %v520_v10 = vld [vmem:[%s1394_s8] sm:$0xff]  ;;  %v521_v11 = vld [vmem:[%s1394_s8 + $0x8] sm:$0xff]  ;;  %v1418_v13 = vmul.f32 %v516_v8, %v1409_v6  ;;  %v1421_v14 = vmul.f32 %v517_v9, %v1411_v7 }
  0x28   : > { %v1424_v15 = vmul.f32 %v521_v11, %v1411_v7  ;;  %v1427_v16 = vmul.f32 %v520_v10, %v1409_v6  ;;  %v514_v17 = vld [vmem:[%s1386_s19] sm:$0xff]  ;;  %v515_v18 = vld [vmem:[%s1386_s19 + $0x8] sm:$0xff] }
  0x29   : > { %473 = vsyncadd [#allocation5 + $0x2], 32  ;;  %526 = vadd.xlane.f32.xlu0 %v525_v12  ;;  %v539_v19 = vand.u32 2147483647, %v514_v17  ;;  %v540_v20 = vand.u32 2147483647, %v515_v18  ;;  %v543_v21 = vsub.f32 %v1418_v13, %v514_v17  ;;  %v544_v22 = vsub.f32 %v1421_v14, %v515_v18 }
  0x2a   : > { %p474_p8 = scmp.eq.s32.totalorder %s1285_s25, 0  ;;  %p475_p9 = scmp.eq.s32.totalorder %s1281_s24, 0  ;;  %v564_v32 = vlaneseq }
  0x2b   : > { %v541_v23 = vmul.f32 10.0, %v539_v19  ;;  %v542_v24 = vmul.f32 10.0, %v540_v20  ;;  %s1299_s24 = smov 0.0  }
  0x2c   : > { %p1437_p10 = pnand %p475_p9, %p474_p8  ;;  %v565_v33 = vand.u32 127, %v564_v32  ;;  %v1476_v37 = vshrl.u32 %v564_v32, 7 }
  0x2d   : > { %v545_v25 = vmul.f32 %v543_v21, %v541_v23  ;;  %v546_v26 = vmul.f32 %v544_v22, %v542_v24 }
  0x2e   : > { %1169 = sst [smem:[#allocation6]] (!%p1437_p10), %s1299_s24  ;;  %v1473_v34 = vadd.s32 128, %v565_v33  ;;  %v571_v35 = vand.u32 15, %v565_v33  ;;  %vm597_vm3 = vcmp.lt.s32.totalorder %v1476_v37, 7 }
  0x2f   : > { %v547_v27 = vand.u32 2147483647, %v545_v25  ;;  %v548_v28 = vand.u32 2147483647, %v546_v26  ;;  %1171 = sst [smem:[#allocation6 + $0x2]] (!%p1437_p10), %s1299_s24  ;;  %s524_s25 = sld [smem:[#allocation6]] }
  0x30   : > { %1172 = sst [smem:[#allocation6 + $0x3]] (!%p1437_p10), %s1299_s24  ;;  %v578_v36 = vand.u32 15, %v1473_v34  ;;  %vm1478_vm0 = vcmp.ne.s32.totalorder %v571_v35, 15  ;;  %vm594_vm2 = vcmp.lt.s32.totalorder %v1473_v34, 240 }
  0x31   : > { %v549_v29 = vmul.f32 %v547_v27, %v1409_v6  ;;  %v550_v30 = vmul.f32 %v548_v28, %v1411_v7  ;;  %1173 = sst [smem:[#allocation6 + $0x4]] (!%p1437_p10), %s1299_s24 }
  0x32   : > { %1174 = sst [smem:[#allocation6 + $0x5]] (!%p1437_p10), %s1299_s24  ;;  %vm1482_vm1 = vcmp.ne.s32.totalorder %v578_v36, 15 }
  0x33   : > { %v551_v31 = vadd.f32 %v550_v30, %v549_v29  ;;  %1175 = sst [smem:[#allocation6 + $0x6]] (!%p1437_p10), %s1299_s24 }
  0x34   : > { %1176 = sst [smem:[#allocation6 + $0x7]] (!%p1437_p10), %s1299_s24 }
  0x35   : > { %552 = vadd.xlane.f32.xlu0 %v551_v31  ;;  %1177 = sst [smem:[#allocation6 + $0x8]] (!%p1437_p10), %s1299_s24 }
  0x36   : > { %1178 = sst [smem:[#allocation6 + $0x9]] (!%p1437_p10), %s1299_s24 }
  0x37   : > { %1179 = sst [smem:[#allocation6 + $0xa]] (!%p1437_p10), %s1299_s24 }
  0x38   : > { %1180 = sst [smem:[#allocation6 + $0xb]] (!%p1437_p10), %s1299_s24 }
  0x39   : > { %1181 = sst [smem:[#allocation6 + $0xc]] (!%p1437_p10), %s1299_s24 }
  0x3a   : > { %1182 = sst [smem:[#allocation6 + $0xd]] (!%p1437_p10), %s1299_s24 }
  0x3b   : > { %1183 = sst [smem:[#allocation6 + $0xe]] (!%p1437_p10), %s1299_s24 }
  0x3c   : > { %1184 = sst [smem:[#allocation6 + $0xf]] (!%p1437_p10), %s1299_s24 }
  0x3d   : > { %1170 = sst [smem:[#allocation6 + $0x1]] (!%p1437_p10), %s1299_s24 }
  0x3e   : > { %s1120_s19 = sld [smem:[#allocation6 + $0x1]] }
  0xb6   : > { %v527_v40 = vpop.xlane.xlu0 %526 }
  0xb7   : > { %v528_v41 = vrot.slane %v527_v40, 4 }
  0xb9   : > { %v529_v42 = vadd.f32 %v528_v41, %v527_v40 }
  0xbb   : > { %v530_v43 = vrot.slane %v529_v42, 2 }
  0xbd   : > { %v531_v44 = vadd.f32 %v530_v43, %v529_v42 }
  0xbf   : > { %v532_v45 = vrot.slane %v531_v44, 1 }
  0xc1   : > { %v533_v46 = vadd.f32 %v532_v45, %v531_v44 }
  0xc2   : > { %v553_v47 = vpop.xlane.xlu0 %552 }
  0xc3   : > { %v554_v48 = vrot.slane %v553_v47, 4  ;;  %1140 = vpush %v533_v46 }
  0xc5   : > { %v555_v49 = vadd.f32 %v554_v48, %v553_v47 }
  0xc7   : > { %v556_v50 = vrot.slane %v555_v49, 2 }
  0xc9   : > { %v557_v51 = vadd.f32 %v556_v50, %v555_v49 }
  0xcb   : > { %v558_v52 = vrot.slane %v557_v51, 1 }
  0xcd   : > { %v559_v53 = vadd.f32 %v558_v52, %v557_v51 }
  0xcf   : > { %1142 = vpush %v559_v53 }
  0xf4   : > { %s1141_s30 = spop %1140 }
  0xf5   : > { %s535_s8 = sadd.f32 %s1141_s30, %s524_s25 }
  0xf7   : > { %537 = sst [smem:[#allocation6]] %s535_s8 }
 0x100   : > { %s1143_s22 = spop %1142 }
 0x101   : > { %s561_s10 = sadd.f32 %s1143_s22, %s1120_s19 }
 0x103   : > { %563 = sst [smem:[#allocation6 + $0x1]] %s561_s10 }
 0x104   : > { %1269 = dma.done.wait [#allocation5], 32 }
 0x105   : > { %1270 = vsyncadd [#allocation5], 4294967264 }
 0x106   : > { %1271 = dma.done.wait [#allocation5 + $0x1], 32 }
 0x107   : > { %1272 = vsyncadd [#allocation5 + $0x1], 4294967264 }
 0x108   : > { %1273 = dma.done.wait [#allocation5 + $0x2], 32 }
 0x109   : > { %1274 = vsyncadd [#allocation5 + $0x2], 4294967264  ;;  %s1300_s9 = smov 127   ;;  %v605_v54 = vld [vmem:[#allocation4] sm:$0x3]  ;;  %v808_v56 = vsub.s32 0, %v1476_v37 }
 0x10a   : > { %660 = vrot.lane.b32.xlu1 %v1418_v13, %s1300_s9  ;;  %612 = vrot.lane.b32.xlu0 %v1427_v16, %s1300_s9  ;;  %v606_v55 = vld [vmem:[#allocation2] sm:$0x3]  ;;  %v812_v57 = vsub.s32 1, %v1476_v37  ;;  %s1301_s11 = smov 112   ;;  %v852_v59 = vrot.slane %v1418_v13, 1  ;;  %v853_v60 = vrot.slane %v1421_v14, 1 }
 0x10b   : > { %v607_v58 = vmul.f32 %v606_v55, %v605_v54  ;;  %v608_v2 = vld [vmem:[#allocation3] sm:$0x3]  ;;  %v796_v17 = vrot.slane %v1427_v16, 1  ;;  %v797_v18 = vrot.slane %v1424_v15, 1  ;;  %vm616_vm4 = vcmask 1039360   ;;  %s1121_s12 = sld [smem:[#allocation6 + $0x2]] }
 0x10c   : > { %v609_v8 = vmul.f32 %v608_v2, %v605_v54  ;;  %vm709_vm5 = vcmask 916480   ;;  %s1122_s17 = sld [smem:[#allocation6 + $0x3]]  ;;  %s1123_s18 = sld [smem:[#allocation6 + $0x8]] }
 0x10d   : > { %v862_v61 = vrot.slane %v607_v58, %v808_v56  ;;  %v866_v62 = vrot.slane %v607_v58, %v812_v57  ;;  %s1124_s20 = sld [smem:[#allocation6 + $0x9]]  ;;  %s1125_s29 = sld [smem:[#allocation6 + $0x4]] }
 0x10e   : > { %662 = vrot.lane.b32.xlu1 %v1421_v14, %s1300_s9  ;;  %614 = vrot.lane.b32.xlu0 %v1424_v15, %s1300_s9  ;;  %v809_v19 = vrot.slane %v609_v8, %v808_v56  ;;  %v813_v20 = vrot.slane %v609_v8, %v812_v57  ;;  %s1126_s21 = sld [smem:[#allocation6 + $0x5]]  ;;  %s1127_s13 = sld [smem:[#allocation6 + $0xa]] }
 0x10f   : > { %v869_v63 = vsel %vm597_vm3, %v852_v59, %v862_v61  ;;  %v870_v0 = vsel %vm597_vm3, %v853_v60, %v866_v62  ;;  %s1128_s30 = sld [smem:[#allocation6 + $0xb]]  ;;  %s1129_s10 = sld [smem:[#allocation6 + $0x6]] }
 0x110   : > { %v871_v1 = vsub.f32 %v869_v63, %v1418_v13  ;;  %v872_v3 = vsub.f32 %v870_v0, %v1421_v14  ;;  %v816_v21 = vsel %vm597_vm3, %v796_v17, %v809_v19  ;;  %v817_v22 = vsel %vm597_vm3, %v797_v18, %v813_v20  ;;  %s1131_s1 = sld [smem:[#allocation6 + $0xc]] }
 0x111   : > { %v818_v23 = vsub.f32 %v816_v21, %v1427_v16  ;;  %v819_v24 = vsub.f32 %v817_v22, %v1424_v15 }
 0x112   : > { %707 = vrot.lane.b32.xlu1 %v1424_v15, %s1301_s11  ;;  %705 = vrot.lane.b32.xlu0 %v1427_v16, %s1301_s11  ;;  %v873_v4 = vmul.f32 %v871_v1, %v1409_v6  ;;  %v874_v5 = vmul.f32 %v872_v3, %v1411_v7 }
 0x113   : > { %v820_v25 = vmul.f32 %v818_v23, %v1409_v6  ;;  %v821_v26 = vmul.f32 %v819_v24, %v1411_v7 }
 0x114   : > { %v890_v9 = vmul.f32 %v873_v4, %v871_v1  ;;  %v1508_v10 = vadd.f32 %v874_v5, %v873_v4  ;;  %v891_v11 = vmul.f32 %v874_v5, %v872_v3 }
 0x115   : > { %v837_v27 = vmul.f32 %v820_v25, %v818_v23  ;;  %v838_v28 = vmul.f32 %v821_v26, %v819_v24  ;;  %v823_v30 = vadd.f32 %v821_v26, %v820_v25 }
 0x116   : > { %753 = vrot.lane.b32.xlu1 %v1421_v14, %s1301_s11  ;;  %751 = vrot.lane.b32.xlu0 %v1418_v13, %s1301_s11  ;;  %v1510_v12 = vadd.f32 %v891_v11, %v890_v9  ;;  %s1130_s11 = sld [smem:[#allocation6 + $0x7]] }
 0x117   : > { %v839_v29 = vadd.f32 %v838_v28, %v837_v27 }
 0x135   : > { %840 = vadd.xlane.f32.xlu0 %v839_v29 }
 0x13a   : > { %824 = vadd.xlane.f32.xlu1 %v823_v30 }
 0x17c   : > { %v661_v31 = vpop.permute.xlu1 %660  ;;  %v613_v32 = vpop.permute.xlu0 %612 }
 0x180   : > { %v663_v33 = vpop.permute.xlu1 %662  ;;  %v615_v35 = vpop.permute.xlu0 %614 }
 0x181   : > { %v664_v36 = vsel %vm616_vm4, %v661_v31, %v663_v33  ;;  %v668_v37 = vsel %vm616_vm4, %v663_v33, %v661_v31  ;;  %v617_v40 = vsel %vm616_vm4, %v613_v32, %v615_v35  ;;  %v621_v41 = vsel %vm616_vm4, %v615_v35, %v613_v32 }
 0x182   : > { %v669_v42 = vsub.f32 %v664_v36, %v1418_v13  ;;  %v670_v43 = vsub.f32 %v668_v37, %v1421_v14  ;;  %v622_v44 = vsub.f32 %v617_v40, %v1427_v16  ;;  %v623_v45 = vsub.f32 %v621_v41, %v1424_v15 }
 0x184   : > { %v671_v46 = vsel %vm1478_vm0, %v669_v42, 0.0  ;;  %v672_v47 = vsel %vm1482_vm1, %v670_v43, 0.0  ;;  %v624_v48 = vsel %vm1478_vm0, %v622_v44, 0.0  ;;  %v625_v49 = vsel %vm1482_vm1, %v623_v45, 0.0  ;;  %v708_v50 = vpop.permute.xlu1 %707  ;;  %v706_v51 = vpop.permute.xlu0 %705 }
 0x185   : > { %v710_v52 = vsel %vm709_vm5, %v706_v51, %v708_v50  ;;  %v714_v53 = vsel %vm709_vm5, %v708_v50, %v706_v51  ;;  %v626_v54 = vmul.f32 %v624_v48, %v1409_v6  ;;  %v627_v55 = vmul.f32 %v625_v49, %v1411_v7 }
 0x186   : > { %v715_v56 = vsub.f32 %v710_v52, %v1427_v16  ;;  %v716_v57 = vsub.f32 %v714_v53, %v1424_v15  ;;  %v673_v38 = vmul.f32 %v671_v46, %v1409_v6  ;;  %v674_v39 = vmul.f32 %v672_v47, %v1411_v7 }
 0x187   : > { %v629_v58 = vadd.f32 %v627_v55, %v626_v54  ;;  %v643_v17 = vmul.f32 %v626_v54, %v624_v48  ;;  %v644_v18 = vmul.f32 %v627_v55, %v625_v49 }
 0x188   : > { %v718_v59 = vsel %vm594_vm2, %v716_v57, 0.0  ;;  %v754_v60 = vpop.permute.xlu1 %753  ;;  %v752_v61 = vpop.permute.xlu0 %751  ;;  %v719_v62 = vmul.f32 %v715_v56, %v1409_v6  ;;  %v676_v2 = vadd.f32 %v674_v39, %v673_v38  ;;  %v690_v4 = vmul.f32 %v673_v38, %v671_v46 }
 0x189   : > { %v755_v63 = vsel %vm709_vm5, %v752_v61, %v754_v60  ;;  %v759_v0 = vsel %vm709_vm5, %v754_v60, %v752_v61  ;;  %630 = vadd.xlane.f32.xlu0 %v629_v58  ;;  %v720_v16 = vmul.f32 %v718_v59, %v1411_v7  ;;  %v691_v5 = vmul.f32 %v674_v39, %v672_v47 }
 0x18a   : > { %v760_v15 = vsub.f32 %v755_v63, %v1418_v13  ;;  %v761_v1 = vsub.f32 %v759_v0, %v1421_v14  ;;  %v736_v13 = vmul.f32 %v719_v62, %v715_v56  ;;  %v645_v22 = vadd.f32 %v644_v18, %v643_v17 }
 0x18b   : > { %v722_v3 = vadd.f32 %v720_v16, %v719_v62  ;;  %v692_v19 = vadd.f32 %v691_v5, %v690_v4  ;;  %v737_v21 = vmul.f32 %v720_v16, %v718_v59 }
 0x18c   : > { %v763_v8 = vsel %vm594_vm2, %v761_v1, 0.0  ;;  %v764_v9 = vmul.f32 %v760_v15, %v1409_v6 }
 0x18d   : > { %677 = vadd.xlane.f32.xlu0 %v676_v2  ;;  %723 = vadd.xlane.f32.xlu1 %v722_v3  ;;  %v765_v11 = vmul.f32 %v763_v8, %v1411_v7  ;;  %v738_v14 = vadd.f32 %v737_v21, %v736_v13 }
 0x18e   : > { %v781_v23 = vmul.f32 %v764_v9, %v760_v15 }
 0x18f   : > { %v767_v20 = vadd.f32 %v765_v11, %v764_v9  ;;  %v782_v24 = vmul.f32 %v765_v11, %v763_v8 }
 0x191   : > { %693 = vadd.xlane.f32.xlu0 %v692_v19  ;;  %768 = vadd.xlane.f32.xlu1 %v767_v20  ;;  %v783_v34 = vadd.f32 %v782_v24, %v781_v23 }
 0x195   : > { %739 = vadd.xlane.f32.xlu0 %v738_v14  ;;  %646 = vadd.xlane.f32.xlu1 %v645_v22 }
 0x199   : > { %784 = vadd.xlane.f32.xlu0 %v783_v34  ;;  %877 = vadd.xlane.f32.xlu1 %v1508_v10 }
 0x19d   : > { %893 = vadd.xlane.f32.xlu0 %v1510_v12 }
 0x1c2   : > { %v841_v6 = vpop.xlane.xlu0 %840 }
 0x1c3   : > { %v842_v42 = vrot.slane %v841_v6, 4 }
 0x1c5   : > { %v843_v53 = vadd.f32 %v842_v42, %v841_v6 }
 0x1c7   : > { %v825_v7 = vpop.xlane.xlu1 %824  ;;  %v844_v16 = vrot.slane %v843_v53, 2 }
 0x1c8   : > { %v826_v10 = vrot.slane %v825_v7, 4 }
 0x1c9   : > { %v845_v23 = vadd.f32 %v844_v16, %v843_v53 }
 0x1ca   : > { %v827_v54 = vadd.f32 %v826_v10, %v825_v7 }
 0x1cc   : > { %v828_v15 = vrot.slane %v827_v54, 2 }
 0x1ce   : > { %v829_v22 = vadd.f32 %v828_v15, %v827_v54 }
 0x216   : > { %v631_v25 = vpop.xlane.xlu0 %630 }
 0x217   : > { %v632_v26 = vrot.slane %v631_v25, 4 }
 0x219   : > { %v633_v27 = vadd.f32 %v632_v26, %v631_v25 }
 0x21a   : > { %v678_v28 = vpop.xlane.xlu0 %677  ;;  %v724_v29 = vpop.xlane.xlu1 %723 }
 0x21b   : > { %v634_v30 = vrot.slane %v633_v27, 2  ;;  %v679_v31 = vrot.slane %v678_v28, 4  ;;  %v725_v32 = vrot.slane %v724_v29, 4 }
 0x21d   : > { %v635_v33 = vadd.f32 %v634_v30, %v633_v27  ;;  %v680_v35 = vadd.f32 %v679_v31, %v678_v28  ;;  %v726_v43 = vadd.f32 %v725_v32, %v724_v29  ;;  %v830_v32 = vrot.slane %v829_v22, 1 }
 0x21e   : > { %v694_v36 = vpop.xlane.xlu0 %693  ;;  %v769_v37 = vpop.xlane.xlu1 %768 }
 0x21f   : > { %v695_v40 = vrot.slane %v694_v36, 4  ;;  %v770_v41 = vrot.slane %v769_v37, 4  ;;  %v636_v12 = vrot.slane %v635_v33, 1  ;;  %v681_v45 = vrot.slane %v680_v35, 2 }
 0x220   : > { %v727_v55 = vrot.slane %v726_v43, 2  ;;  %v831_v42 = vadd.f32 %v830_v32, %v829_v22 }
 0x221   : > { %v696_v44 = vadd.f32 %v695_v40, %v694_v36  ;;  %v771_v46 = vadd.f32 %v770_v41, %v769_v37  ;;  %v637_v49 = vadd.f32 %v636_v12, %v635_v33  ;;  %v682_v59 = vadd.f32 %v681_v45, %v680_v35 }
 0x222   : > { %v740_v47 = vpop.xlane.xlu0 %739  ;;  %v647_v48 = vpop.xlane.xlu1 %646  ;;  %v728_v1 = vadd.f32 %v727_v55, %v726_v43  ;;  %v846_v37 = vrot.slane %v845_v23, 1 }
 0x223   : > { %v697_v50 = vrot.slane %v696_v44, 2  ;;  %v741_v51 = vrot.slane %v740_v47, 4  ;;  %v648_v52 = vrot.slane %v647_v48, 4  ;;  %1144 = vpush %v637_v49  ;;  %v772_v58 = vrot.slane %v771_v46, 2 }
 0x224   : > { %v683_v9 = vrot.slane %v682_v59, 1  ;;  %v729_v21 = vrot.slane %v728_v1, 1  ;;  %v847_v43 = vadd.f32 %v846_v37, %v845_v23 }
 0x225   : > { %v742_v56 = vadd.f32 %v741_v51, %v740_v47  ;;  %v649_v57 = vadd.f32 %v648_v52, %v647_v48  ;;  %v698_v60 = vadd.f32 %v697_v50, %v696_v44  ;;  %v773_v17 = vadd.f32 %v772_v58, %v771_v46 }
 0x226   : > { %v785_v38 = vpop.xlane.xlu0 %784  ;;  %v878_v39 = vpop.xlane.xlu1 %877  ;;  %v684_v25 = vadd.f32 %v683_v9, %v682_v59  ;;  %v730_v31 = vadd.f32 %v729_v21, %v728_v1 }
 0x227   : > { %v743_v61 = vrot.slane %v742_v56, 2  ;;  %v650_v62 = vrot.slane %v649_v57, 2  ;;  %v786_v63 = vrot.slane %v785_v38, 4  ;;  %v879_v0 = vrot.slane %v878_v39, 4 }
 0x228   : > { %v699_v11 = vrot.slane %v698_v60, 1  ;;  %v774_v26 = vrot.slane %v773_v17, 1 }
 0x229   : > { %v787_v2 = vadd.f32 %v786_v63, %v785_v38  ;;  %v880_v3 = vadd.f32 %v879_v0, %v878_v39  ;;  %v651_v4 = vadd.f32 %v650_v62, %v649_v57  ;;  %v744_v5 = vadd.f32 %v743_v61, %v742_v56 }
 0x22a   : > { %v894_v8 = vpop.xlane.xlu0 %893  ;;  %v700_v28 = vadd.f32 %v699_v11, %v698_v60  ;;  %v775_v40 = vadd.f32 %v774_v26, %v773_v17 }
 0x22b   : > { %v788_v18 = vrot.slane %v787_v2, 2  ;;  %v881_v19 = vrot.slane %v880_v3, 2  ;;  %v895_v20 = vrot.slane %v894_v8, 4  ;;  %v652_v13 = vrot.slane %v651_v4, 1 }
 0x22c   : > { %v745_v14 = vrot.slane %v744_v5, 1 }
 0x22d   : > { %v882_v24 = vadd.f32 %v881_v19, %v880_v3  ;;  %v896_v34 = vadd.f32 %v895_v20, %v894_v8  ;;  %v653_v6 = vadd.f32 %v652_v13, %v651_v4  ;;  %v789_v7 = vadd.f32 %v788_v18, %v787_v2 }
 0x22e   : > { %v746_v29 = vadd.f32 %v745_v14, %v744_v5 }
 0x22f   : > { %v897_v27 = vrot.slane %v896_v34, 2  ;;  %1146 = vpush %v653_v6  ;;  %v790_v30 = vrot.slane %v789_v7, 1  ;;  %v883_v33 = vrot.slane %v882_v24, 1 }
 0x230   : > { %1148 = vpush %v684_v25 }
 0x231   : > { %v898_v35 = vadd.f32 %v897_v27, %v896_v34  ;;  %1150 = vpush %v700_v28  ;;  %v791_v36 = vadd.f32 %v790_v30, %v789_v7  ;;  %v884_v10 = vadd.f32 %v883_v33, %v882_v24 }
 0x232   : > { %1152 = vpush %v730_v31 }
 0x233   : > { %1154 = vpush %v746_v29  ;;  %v899_v41 = vrot.slane %v898_v35, 1 }
 0x234   : > { %1156 = vpush %v775_v40 }
 0x235   : > { %1158 = vpush %v791_v36  ;;  %v900_v12 = vadd.f32 %v899_v41, %v898_v35 }
 0x236   : > { %1160 = vpush %v831_v42 }
 0x237   : > { %1162 = vpush %v847_v43 }
 0x238   : > { %1164 = vpush %v884_v10 }
 0x239   : > { %1166 = vpush %v900_v12 }
 0x254   : > { %s1145_s14 = spop %1144 }
 0x255   : > { %s639_s15 = sadd.f32 %s1145_s14, %s1121_s12 }
 0x257   : > { %641 = sst [smem:[#allocation6 + $0x2]] %s639_s15 }
 0x260   : > { %s1147_s16 = spop %1146 }
 0x261   : > { %s655_s23 = sadd.f32 %s1147_s16, %s1122_s17  ;;  %s1149_s27 = spop %1148 }
 0x262   : > { %s686_s0 = sadd.f32 %s1149_s27, %s1123_s18  ;;  %s1151_s24 = spop %1150 }
 0x263   : > { %657 = sst [smem:[#allocation6 + $0x3]] %s655_s23  ;;  %s1153_s25 = spop %1152 }
 0x264   : > { %688 = sst [smem:[#allocation6 + $0x8]] %s686_s0  ;;  %s1155_s19 = spop %1154 }
 0x265   : > { %s702_s8 = sadd.f32 %s1151_s24, %s1124_s20  ;;  %s1157_s9 = spop %1156 }
 0x266   : > { %s732_s22 = sadd.f32 %s1153_s25, %s1125_s29  ;;  %s1159_s14 = spop %1158 }
 0x267   : > { %704 = sst [smem:[#allocation6 + $0x9]] %s702_s8  ;;  %s1161_s17 = spop %1160 }
 0x268   : > { %734 = sst [smem:[#allocation6 + $0x4]] %s732_s22  ;;  %s1132_s18 = sld [smem:[#allocation6 + $0xd]] }
 0x269   : > { %s748_s12 = sadd.f32 %s1155_s19, %s1126_s21  ;;  %s1163_s23 = spop %1162 }
 0x26a   : > { %s777_s15 = sadd.f32 %s1157_s9, %s1127_s13  ;;  %s1165_s20 = spop %1164 }
 0x26b   : > { %750 = sst [smem:[#allocation6 + $0x5]] %s748_s12  ;;  %s912_s25 = sshll.u32 %s1595_s7, 4  ;;  %s913_s25 = int_to_ptr.vmem [resolvable:$true] %s912_s25 }
 0x26c   : > { %779 = sst [smem:[#allocation6 + $0xa]] %s777_s15  ;;  %s1167_s8 = spop %1166 }
 0x26d   : > { %s793_s16 = sadd.f32 %s1159_s14, %s1128_s30  ;;  %s1609_s13 = sadd.s32 4294967295, %s1297_s28  }
 0x26e   : > { %s833_s27 = sadd.f32 %s1161_s17, %s1129_s10  ;;  %p1561_p11 = scmp.eq.s32.totalorder %s1609_s13, 3 }
 0x26f   : > { %795 = sst [smem:[#allocation6 + $0xb]] %s793_s16  ;;  %s1235_s22 = scalar_lea.vmem %s913_s25, 16 }
 0x270   : > { %835 = sst [smem:[#allocation6 + $0x6]] %s833_s27  ;;  %p1236_p12 = scmp.ne.s32.totalorder %s913_s25, %s1235_s22 }
 0x271   : > { %s849_s29 = sadd.f32 %s1163_s23, %s1130_s11  ;;  %p1242_p1 = scmp.lt.s32.totalorder %s913_s25, %s913_s25 }
 0x272   : > { %s886_s21 = sadd.f32 %s1165_s20, %s1131_s1  ;;  %p1237_p13 = pnand %p1236_p12, %p1561_p11 }
 0x273   : > { %851 = sst [smem:[#allocation6 + $0x7]] %s849_s29  ;;  %p1243_p2 = scmp.lt.s32.totalorder %s1235_s22, %s1235_s22 }
 0x274   : > { %888 = sst [smem:[#allocation6 + $0xc]] %s886_s21  ;;  %p1238_p0 = pneg %p1237_p13 }
 0x275   : > { %s902_s30 = sadd.f32 %s1167_s8, %s1132_s18  ;;  %p1244_p3 = por %p1243_p2, %p1242_p1 }
 0x277   : > { %904 = sst [smem:[#allocation6 + $0xd]] %s902_s30  ;;  %p1245_p4 = pnand %p1244_p3, %p1238_p0 }
 0x279   : > { %1248 = shalt.err (!%p1245_p4)
}
 0x27a   : > { %s1302_s1 = smov [#allocation6]  }
 0x27b   : > { %1186 = dma.smem_to_vmem (%p1561_p11), %s1302_s1, 16, %s913_s25, [#allocation7]  }
 0x27c   : > { %1276 = dma.done.wait (%p1561_p11), [#allocation7], 16  }
 0x27d   : > { %1278 = vsyncadd (%p1561_p11), [#allocation7], 4294967280 }
 0x27e   : > { %920 = sfence }
 0x27f PF: > { %s18_s28 = sadd.s32 1, %s1297_s28   ;;  %s1611_s25 = sld [smem:[#allocation15_spill]] }
 0x280   : > { %p15_p5 = scmp.ge.s32.totalorder %s18_s28, 6   ;;  %s1612_s10 = sld [smem:[#allocation16_spill]] }
 0x281   : > { %s1613_s27 = sld [smem:[#allocation17_spill]]  ;;  %s1614_s24 = smov %s1289_s26 }
 0x282   :  { %17 = sbr.rel (!%p15_p5) target bundleno = 6 (0x6), region = 233 }
 0x286   : > { %s1615_s26 = smov %s1612_s10 }
 0x289   :  { %926 = vsyncpa [#allocation7], 1 }
 0x28a   :  { %928 = vsyncpa [#allocation7 + $0x1], 1 }
 0x28b   :  { %929 = vsyncmov [#allocation5] }
 0x28e   :  { %s930_s9 = vpop.sfrf %929 }
 0x28f   :  { %p1137_p6 = scmp.ne.s32.totalorder %s930_s9, 0 }
 0x291   :  { %934 = shalt.err (%p1137_p6)  }
 0x292   :  { %936 = vsyncmov [#allocation5 + $0x1] }
 0x295   :  { %s937_s11 = vpop.sfrf %936 }
 0x296   :  { %p1138_p7 = scmp.ne.s32.totalorder %s937_s11, 0 }
 0x298   :  { %941 = shalt.err (%p1138_p7)  }
 0x299   :  { %943 = vsyncmov [#allocation5 + $0x2] }
 0x29c   :  { %s944_s12 = vpop.sfrf %943 }
 0x29d   :  { %p1139_p8 = scmp.ne.s32.totalorder %s944_s12, 0 }
 0x29f   :  { %948 = shalt.err (%p1139_p8)  }

// kernel: net_loss.3
= control target key start
LH: loop header
LB: loop body
LE: loop exit
PB: predicated region body
PF: predicated region fallthrough
CT: control target
= control target key end

     0   :  { %s1430_s0 = inlined_call_operand.vmem [shape: f32[16], index: 0, kind: input, shape index: {}]   ;;  %s1431_s1 = inlined_call_operand.vmem [shape: f32[2,16,256], index: 1, kind: input, shape index: {}, may-alias: {1,4}]   ;;  %s1432_s2 = inlined_call_operand.vmem [shape: f32[2,16,256], index: 2, kind: input, shape index: {}, may-alias: {2,5}]   ;;  %s1433_s3 = inlined_call_operand.vmem [shape: f32[2,16,256], index: 3, kind: input, shape index: {}, may-alias: {3,6}]   ;;  %s1434_s4 = inlined_call_operand.vmem [shape: f32[2,16,256], index: 4, kind: input, shape index: {}, may-alias: {1,4}]   ;;  %s1435_s5 = inlined_call_operand.vmem [shape: f32[2,16,256], index: 5, kind: input, shape index: {}, may-alias: {2,5}]   ;;  %s1436_s6 = inlined_call_operand.vmem [shape: f32[2,16,256], index: 6, kind: input, shape index: {}, may-alias: {3,6}]   ;;  %s1437_s7 = inlined_call_operand.vmem [shape: f32[8], index: 7, kind: output, shape index: {}]  }
   0x1   :  { %1439 = sst [smem:[#allocation19_spill]] %s1430_s0 }
   0x2   :  { %12 = vsyncpa [#allocation7], 0 }
   0x3   :  { %13 = vsyncpa [#allocation8], 0  ;;  %s1177_s24 = smov 0   ;;  %s1179_s25 = smov 0  }
   0x4   :  { %s1181_s26 = smov 0   ;;  %s1183_s27 = smov 0  }
   0x5   :  { %s1185_s28 = smov 0  }
   0x6 LB: > { %s1438_s29 = sadd.s32 4294967295, %s1130_s28   ;;  %s28_s30 = sadd.s32 1, %s1122_s26  ;;  %s1130_s28 = sphi %s1185_s28, %s19_s28   ;;  %s1126_s27 = sphi %s1183_s27, %s1455_s27   ;;  %s1122_s26 = sphi %s1181_s26, %s1454_s26   ;;  %s1118_s25 = sphi %s1179_s25, %s1453_s25   ;;  %s1114_s24 = sphi %s1177_s24, %s1452_s24  }
   0x7   : > { %p29_p0 = scmp.ge.s32.totalorder %s28_s30, 2  ;;  %s31_s8 = sadd.s32 1, %s1126_s27 }
   0x8   : > { %p938_p1 = scmp.ge.s32.totalorder %s1130_s28, 1  ;;  %p162_p2 = scmp.lt.s32.totalorder %s1130_s28, 5 }
   0x9   : > { %s1457_s30 = smov (%p29_p0, %s28_s30), 0  ;;  %s1459_s8 = smov (!%p29_p0, %s31_s8), %s1126_s27 }
   0xa   : > { %p1210_p3 = pnand %p938_p1, %p162_p2  ;;  %p33_p4 = scmp.ge.s32.totalorder %s1459_s8, 2 }
   0xb   : > { %p1216_p5 = scmp.eq.s32.totalorder %s1438_s29, 0  ;;  %s1442_s0 = sld [smem:[#allocation19_spill]] }
   0xc   : > { %p996_p6 = pneg %p1210_p3  ;;  %s1461_s8 = smov (%p33_p4, %s1459_s8), 0 }
   0xd   : > { %1443 = sst [smem:[#allocation18_spill]] %s1461_s8 }
   0xe   : > { %p997_p7 = pnand %p1216_p5, %p996_p6 }
  0x10   : > { %p1051_p9 = pneg %p997_p7 }
  0x11   : > { %s175_s13 = sshll.u32 %s1442_s0, 4  ;;  %s176_s13 = int_to_ptr.vmem [resolvable:$true] %s175_s13 }
  0x12   : > { %s1049_s14 = scalar_lea.vmem %s176_s13, 16  ;;  %p1057_p12 = scmp.lt.s32.totalorder %s176_s13, %s176_s13 }
  0x13   : > { %p1050_p8 = scmp.ne.s32.totalorder %s176_s13, %s1049_s14  ;;  %p1058_p13 = scmp.lt.s32.totalorder %s1049_s14, %s1049_s14 }
  0x15   : > { %p1052_p10 = pnand %p1051_p9, %p1050_p8  ;;  %p1059_p0 = por %p1058_p13, %p1057_p12 }
  0x17   : > { %p1053_p11 = pneg %p1052_p10 }
  0x19   : > { %p1060_p1 = pnand %p1059_p0, %p1053_p11 }
  0x1b   : > { %1063 = shalt.err (!%p1060_p1)
}
  0x1c   : > { %s1132_s15 = smov [#allocation6]   ;;  %224 = sbr.rel (%p1210_p3) target bundleno = 441 (0x1b9), region = 36 }
  0x1d   : > { %999 = dma.vmem_to_smem (!%p997_p7), %s176_s13, 16, %s1132_s15, [#allocation7]  }
  0x23   : > { %1099 = dma.done.wait (%p1216_p5), [#allocation7], 16  }
  0x24   : > { %1101 = vsyncadd (%p1216_p5), [#allocation7], 4294967280 }
  0x25   : > { %230 = sfence }
  0x26   : > { %p268_p2 = scmp.lt.s32.totalorder %s1118_s25, 1  ;;  %p270_p4 = scmp.lt.s32.totalorder %s1114_s24, 1 }
  0x27   : > { %s952_s16 = sshll.u32 %s1114_s24, 3 }
  0x28   : > { %s269_s17 = scalar_select %p268_p2, %s1118_s25, 1 }
  0x29   : > { %s271_s18 = scalar_select %p270_p4, %s1114_s24, 1 }
  0x2a   : > { %s944_s19 = sshll.u32 %s269_s17, 2  ;;  %s296_s20 = sadd.s32 8, %s952_s16 }
  0x2b   : > { %s943_s21 = sshll.u32 %s271_s18, 1  ;;  %p297_p3 = scmp.lt.s32.totalorder %s296_s20, 15 }
  0x2c   : > { %s274_s22 = sadd.s32 %s944_s19, %s943_s21  ;;  %s954_s16 = sshll.u32 %s1118_s25, 5 }
  0x2d   : > { %s945_s23 = sshll.u32 %s274_s22, 3  ;;  %s1463_s20 = smov (!%p297_p3, %s296_s20), 15 }
  0x2e   : > { %s1243_s11 = scalar_lea.vmem %s1431_s1, %s945_s23  ;;  %s1248_s14 = scalar_lea.vmem %s1432_s2, %s945_s23 }
  0x2f   : > { %s294_s0 = scalar_lea.vmem %s1433_s3, %s945_s23  ;;  %s299_s17 = sshrl.u32 %s1463_s20, 3 }
  0x30   : > { %s300_s18 = sand.u32 7, %s1463_s20   ;;  %s953_s19 = sshll.u32 %s299_s17, 4 }
  0x31   : > { %s302_s21 = sadd.s32 %s953_s19, %s300_s18 }
  0x32   : > { %s304_s22 = sadd.s32 %s954_s16, %s302_s21 }
  0x33   : > { %s305_s10 = scalar_lea.vmem %s1434_s4, %s304_s22 }
  0x34   : > { %v323_v0 = vld [vmem:[%s305_s10] sm:$0x1]  ;;  %v325_v1 = vld [vmem:[%s305_s10 + $0x8] sm:$0x1] }
  0x35   : > { %324 = vst [vmem:[#allocation2] sm:$0x1] %v323_v0  ;;  %326 = vst [vmem:[#allocation2 + $0x1] sm:$0x1] %v325_v1 }
  0x36   : > { %353 = vsyncadd [#allocation5], 32  ;;  %s354_s29 = scalar_lea.vmem %s1435_s5, %s304_s22 }
  0x37   : > { %v373_v2 = vld [vmem:[%s354_s29] sm:$0x1]  ;;  %v375_v3 = vld [vmem:[%s354_s29 + $0x8] sm:$0x1] }
  0x38   : > { %374 = vst [vmem:[#allocation3] sm:$0x1] %v373_v2  ;;  %376 = vst [vmem:[#allocation3 + $0x1] sm:$0x1] %v375_v3 }
  0x39   : > { %403 = vsyncadd [#allocation5 + $0x1], 32  ;;  %s404_s15 = scalar_lea.vmem %s1436_s6, %s304_s22 }
  0x3a   : > { %v423_v4 = vld [vmem:[%s404_s15] sm:$0x1]  ;;  %v425_v5 = vld [vmem:[%s404_s15 + $0x8] sm:$0x1] }
  0x3b   : > { %424 = vst [vmem:[#allocation4] sm:$0x1] %v423_v4  ;;  %426 = vst [vmem:[#allocation4 + $0x1] sm:$0x1] %v425_v5 }
  0x3c   : > { %453 = vsyncadd [#allocation5 + $0x2], 32  ;;  %p454_p5 = scmp.eq.s32.totalorder %s1118_s25, 0  ;;  %p455_p6 = scmp.eq.s32.totalorder %s1114_s24, 0  ;;  %v1265_v6 = vld [vmem:[%s294_s0] sm:$0xff]  ;;  %v1267_v7 = vld [vmem:[%s294_s0 + $0x8] sm:$0xff]  ;;  %v486_v8 = vlaneseq }
  0x3d   : > { %v478_v9 = vld [vmem:[%s1243_s11] sm:$0xff]  ;;  %v479_v10 = vld [vmem:[%s1243_s11 + $0x8] sm:$0xff]  ;;  %s1133_s0 = smov 0.0  }
  0x3e   : > { %v482_v11 = vld [vmem:[%s1248_s14] sm:$0xff]  ;;  %p1272_p7 = pnand %p455_p6, %p454_p5  ;;  %v1277_v12 = vmul.f32 %v478_v9, %v1265_v6  ;;  %v1280_v13 = vmul.f32 %v479_v10, %v1267_v7  ;;  %v483_v14 = vld [vmem:[%s1248_s14 + $0x8] sm:$0xff]  ;;  %v487_v16 = vand.u32 127, %v486_v8  ;;  %v518_v18 = vshrl.u32 %v486_v8, 7 }
  0x3f   : > { %v1284_v15 = vmul.f32 %v482_v11, %v1265_v6  ;;  %v1287_v17 = vmul.f32 %v483_v14, %v1267_v7 }
  0x40   : > { %984 = sst [smem:[#allocation9]] (!%p1272_p7), %s1133_s0  ;;  %v1291_v19 = vadd.s32 128, %v487_v16  ;;  %v493_v20 = vand.u32 15, %v487_v16  ;;  %vm519_vm0 = vcmp.lt.s32.totalorder %v518_v18, 7 }
  0x41   : > { %985 = sst [smem:[#allocation9 + $0x1]] (!%p1272_p7), %s1133_s0 }
  0x42   : > { %986 = sst [smem:[#allocation9 + $0x2]] (!%p1272_p7), %s1133_s0  ;;  %v500_v21 = vand.u32 15, %v1291_v19  ;;  %vm1298_vm1 = vcmp.ne.s32.totalorder %v493_v20, 15  ;;  %vm516_vm2 = vcmp.lt.s32.totalorder %v1291_v19, 240 }
  0x43   : > { %987 = sst [smem:[#allocation9 + $0x3]] (!%p1272_p7), %s1133_s0 }
  0x44   : > { %988 = sst [smem:[#allocation9 + $0x4]] (!%p1272_p7), %s1133_s0  ;;  %vm1307_vm3 = vcmp.ne.s32.totalorder %v500_v21, 15 }
  0x45   : > { %989 = sst [smem:[#allocation9 + $0x5]] (!%p1272_p7), %s1133_s0 }
  0x46   : > { %990 = sst [smem:[#allocation9 + $0x6]] (!%p1272_p7), %s1133_s0 }
  0x47   : > { %991 = sst [smem:[#allocation9 + $0x7]] (!%p1272_p7), %s1133_s0 }
  0x48   : > { %1102 = dma.done.wait [#allocation5], 32 }
  0x49   : > { %1103 = vsyncadd [#allocation5], 4294967264 }
  0x4a   : > { %1104 = dma.done.wait [#allocation5 + $0x1], 32 }
  0x4b   : > { %1105 = vsyncadd [#allocation5 + $0x1], 4294967264 }
  0x4c   : > { %1106 = dma.done.wait [#allocation5 + $0x2], 32 }
  0x4d   : > { %1107 = vsyncadd [#allocation5 + $0x2], 4294967264  ;;  %s1134_s24 = smov 127   ;;  %s1135_s25 = smov 112   ;;  %v527_v24 = vld [vmem:[#allocation4] sm:$0x3] }
  0x4e   : > { %560 = vrot.lane.b32.xlu1 %v1277_v12, %s1134_s24  ;;  %534 = vrot.lane.b32.xlu0 %v1284_v15, %s1134_s24  ;;  %v530_v25 = vld [vmem:[#allocation3] sm:$0x3]  ;;  %v528_v26 = vld [vmem:[#allocation2] sm:$0x3]  ;;  %v676_v28 = vsub.s32 0, %v518_v18  ;;  %v680_v30 = vsub.s32 1, %v518_v18 }
  0x4f   : > { %v531_v27 = vmul.f32 %v530_v25, %v527_v24  ;;  %v529_v29 = vmul.f32 %v528_v26, %v527_v24  ;;  %v664_v31 = vrot.slane %v1284_v15, 1  ;;  %s962_s11 = sld [smem:[#allocation6 + $0x4]]  ;;  %v665_v33 = vrot.slane %v1287_v17, 1  ;;  %s964_s14 = sld [smem:[#allocation6 + $0xa]] }
  0x50   : > { %v698_v34 = vrot.slane %v1277_v12, 1  ;;  %v699_v36 = vrot.slane %v1280_v13, 1  ;;  %s1330_s16 = sld [smem:[#allocation6 + $0x5]]  ;;  %s965_s17 = sld [smem:[#allocation6 + $0xb]]  ;;  %vm538_vm4 = vcmask 1039360   ;;  %vm604_vm5 = vcmask 916480  }
  0x51   : > { %v677_v32 = vrot.slane %v531_v27, %v676_v28  ;;  %v681_v35 = vrot.slane %v531_v27, %v680_v30  ;;  %v708_v37 = vrot.slane %v529_v29, %v676_v28  ;;  %v712_v38 = vrot.slane %v529_v29, %v680_v30  ;;  %s1336_s18 = sld [smem:[#allocation6 + $0x6]]  ;;  %s1338_s19 = sld [smem:[#allocation6 + $0x7]] }
  0x52   : > { %562 = vrot.lane.b32.xlu1 %v1280_v13, %s1134_s24  ;;  %536 = vrot.lane.b32.xlu0 %v1287_v17, %s1134_s24  ;;  %s1343_s21 = sld [smem:[#allocation6]]  ;;  %s1345_s22 = sld [smem:[#allocation6 + $0x1]] }
  0x53   : > { %v684_v39 = vsel %vm519_vm0, %v664_v31, %v677_v32  ;;  %v685_v40 = vsel %vm519_vm0, %v665_v33, %v681_v35  ;;  %v715_v42 = vsel %vm519_vm0, %v698_v34, %v708_v37  ;;  %v716_v43 = vsel %vm519_vm0, %v699_v36, %v712_v38  ;;  %s1348_s9 = sld [smem:[#allocation6 + $0x2]]  ;;  %s1350_s10 = sld [smem:[#allocation6 + $0x3]] }
  0x54   : > { %v686_v41 = vsub.f32 %v684_v39, %v1284_v15  ;;  %v687_v45 = vsub.f32 %v685_v40, %v1287_v17  ;;  %v717_v46 = vsub.f32 %v715_v42, %v1277_v12  ;;  %v718_v47 = vsub.f32 %v716_v43, %v1280_v13  ;;  %s1352_s12 = sld [smem:[#allocation6 + $0x8]]  ;;  %s1375_s13 = sld [smem:[#allocation6 + $0x9]] }
  0x55   : > { %v689_v44 = vstv %s962_s11  ;;  %v720_v49 = vstv %s964_s14  ;;  %s746_s29 = sld [smem:[#allocation9]]  ;;  %s757_s24 = sshll.u32 %s1437_s7, 4  ;;  %s758_s24 = int_to_ptr.vmem [resolvable:$true] %s757_s24 }
  0x56   : > { %602 = vrot.lane.b32.xlu1 %v1287_v17, %s1135_s25  ;;  %600 = vrot.lane.b32.xlu0 %v1284_v15, %s1135_s25  ;;  %v690_v48 = vsub.f32 %v686_v41, %v689_v44  ;;  %v693_v50 = vstv %s1330_s16  ;;  %v691_v51 = vsub.f32 %v687_v45, %v689_v44  ;;  %v721_v52 = vsub.f32 %v717_v46, %v720_v49  ;;  %s1449_s14 = sadd.s32 4294967295, %s1130_s28   ;;  %p1071_p12 = scmp.lt.s32.totalorder %s758_s24, %s758_s24 }
  0x57   : > { %v722_v53 = vsub.f32 %v718_v47, %v720_v49  ;;  %v724_v57 = vstv %s965_s17  ;;  %v574_v58 = vstv %s1336_s18  ;;  %v578_v63 = vstv %s1338_s19  ;;  %p1403_p8 = scmp.eq.s32.totalorder %s1449_s14, 3  ;;  %s1064_s18 = scalar_lea.vmem %s758_s24, 16 }
  0x58   : > { %v694_v56 = vmul.f32 %v693_v50, %v690_v48  ;;  %v695_v59 = vmul.f32 %v693_v50, %v691_v51  ;;  %v725_v60 = vmul.f32 %v724_v57, %v721_v52  ;;  %v549_v1 = vstv %s1343_s21  ;;  %p1065_p9 = scmp.ne.s32.totalorder %s758_s24, %s1064_s18  ;;  %p1072_p13 = scmp.lt.s32.totalorder %s1064_s18, %s1064_s18 }
  0x59   : > { %v726_v61 = vmul.f32 %v724_v57, %v722_v53  ;;  %v553_v2 = vstv %s1345_s22  ;;  %v615_v18 = vstv %s1348_s9  ;;  %v619_v37 = vstv %s1350_s10 }
  0x5a   : > { %626 = vrot.lane.b32.xlu1 %v1280_v13, %s1135_s25  ;;  %624 = vrot.lane.b32.xlu0 %v1277_v12, %s1135_s25  ;;  %v696_v3 = vand.u32 2147483647, %v694_v56  ;;  %v697_v20 = vand.u32 2147483647, %v695_v59  ;;  %v727_v21 = vand.u32 2147483647, %v725_v60  ;;  %v638_v38 = vstv %s1352_s12  ;;  %p1066_p10 = pnand %p1065_p9, %p1403_p8  ;;  %p1073_p0 = por %p1072_p13, %p1071_p12 }
  0x5b   : > { %v728_v24 = vand.u32 2147483647, %v726_v61  ;;  %v642_v57 = vstv %s1375_s13 }
  0x5c   : > { %v729_v45 = vsub.f32 %v727_v21, %v696_v3  ;;  %p1067_p11 = pneg %p1066_p10 }
  0x5d   : > { %v730_v46 = vsub.f32 %v728_v24, %v697_v20 }
  0x5e   : > { %v731_v59 = vand.u32 2147483647, %v729_v45  ;;  %p1074_p1 = pnand %p1073_p0, %p1067_p11 }
  0x5f   : > { %v732_v60 = vand.u32 2147483647, %v730_v46 }
  0xc0   : > { %v561_v54 = vpop.permute.xlu1 %560  ;;  %v535_v55 = vpop.permute.xlu0 %534 }
  0xc4   : > { %v563_v62 = vpop.permute.xlu1 %562  ;;  %v537_v0 = vpop.permute.xlu0 %536 }
  0xc5   : > { %v564_v4 = vsel %vm538_vm4, %v561_v54, %v563_v62  ;;  %v568_v5 = vsel %vm538_vm4, %v563_v62, %v561_v54  ;;  %v539_v8 = vsel %vm538_vm4, %v535_v55, %v537_v0  ;;  %v543_v9 = vsel %vm538_vm4, %v537_v0, %v535_v55 }
  0xc6   : > { %v569_v10 = vsub.f32 %v564_v4, %v1277_v12  ;;  %v570_v11 = vsub.f32 %v568_v5, %v1280_v13  ;;  %v544_v14 = vsub.f32 %v539_v8, %v1284_v15  ;;  %v545_v16 = vsub.f32 %v543_v9, %v1287_v17 }
  0xc7   : > { %v733_v8 = vmul.f32 %v731_v59, %v1265_v6  ;;  %v734_v9 = vmul.f32 %v732_v60, %v1267_v7 }
  0xc8   : > { %v571_v25 = vsel %vm1298_vm1, %v569_v10, 0.0  ;;  %v572_v26 = vsel %vm1307_vm3, %v570_v11, 0.0  ;;  %v546_v27 = vsel %vm1298_vm1, %v544_v14, 0.0  ;;  %v547_v28 = vsel %vm1307_vm3, %v545_v16, 0.0  ;;  %v603_v29 = vpop.permute.xlu1 %602  ;;  %v601_v30 = vpop.permute.xlu0 %600 }
  0xc9   : > { %v575_v31 = vsub.f32 %v571_v25, %v574_v58  ;;  %v576_v32 = vsub.f32 %v572_v26, %v574_v58  ;;  %v550_v33 = vsub.f32 %v546_v27, %v549_v1  ;;  %v551_v34 = vsub.f32 %v547_v28, %v549_v1 }
  0xca   : > { %v605_v35 = vsel %vm604_vm5, %v601_v30, %v603_v29  ;;  %v609_v36 = vsel %vm604_vm5, %v603_v29, %v601_v30  ;;  %v735_v20 = vadd.f32 %v734_v9, %v733_v8 }
  0xcb   : > { %v579_v39 = vmul.f32 %v578_v63, %v575_v31  ;;  %v580_v22 = vmul.f32 %v578_v63, %v576_v32  ;;  %v554_v40 = vmul.f32 %v553_v2, %v550_v33  ;;  %v555_v41 = vmul.f32 %v553_v2, %v551_v34 }
  0xcc   : > { %v610_v23 = vsub.f32 %v605_v35, %v1284_v15  ;;  %v611_v42 = vsub.f32 %v609_v36, %v1287_v17  ;;  %v627_v43 = vpop.permute.xlu1 %626  ;;  %v625_v44 = vpop.permute.xlu0 %624 }
  0xcd   : > { %v581_v47 = vand.u32 2147483647, %v579_v39  ;;  %v582_v48 = vand.u32 2147483647, %v580_v22  ;;  %v556_v49 = vand.u32 2147483647, %v554_v40  ;;  %v628_v50 = vsel %vm604_vm5, %v625_v44, %v627_v43 }
  0xce   : > { %v557_v51 = vand.u32 2147483647, %v555_v41  ;;  %v613_v52 = vsel %vm516_vm2, %v611_v42, 0.0  ;;  %v616_v53 = vsub.f32 %v610_v23, %v615_v18  ;;  %v632_v54 = vsel %vm604_vm5, %v627_v43, %v625_v44 }
  0xcf   : > { %v617_v15 = vsub.f32 %v613_v52, %v615_v18  ;;  %v633_v17 = vsub.f32 %v628_v50, %v1277_v12  ;;  %v634_v55 = vsub.f32 %v632_v54, %v1280_v13  ;;  %v583_v56 = vsub.f32 %v581_v47, %v556_v49 }
  0xd0   : > { %v584_v58 = vsub.f32 %v582_v48, %v557_v51  ;;  %v620_v61 = vmul.f32 %v619_v37, %v616_v53 }
  0xd1   : > { %v636_v62 = vsel %vm516_vm2, %v634_v55, 0.0  ;;  %v639_v63 = vsub.f32 %v633_v17, %v638_v38  ;;  %v585_v0 = vand.u32 2147483647, %v583_v56  ;;  %v621_v1 = vmul.f32 %v619_v37, %v617_v15 }
  0xd2   : > { %v640_v2 = vsub.f32 %v636_v62, %v638_v38  ;;  %v586_v3 = vand.u32 2147483647, %v584_v58  ;;  %v622_v10 = vand.u32 2147483647, %v620_v61 }
  0xd3   : > { %v643_v4 = vmul.f32 %v642_v57, %v639_v63  ;;  %v587_v5 = vmul.f32 %v585_v0, %v1265_v6  ;;  %v623_v14 = vand.u32 2147483647, %v621_v1 }
  0xd4   : > { %v644_v12 = vmul.f32 %v642_v57, %v640_v2  ;;  %v588_v13 = vmul.f32 %v586_v3, %v1267_v7 }
  0xd5   : > { %v645_v11 = vand.u32 2147483647, %v643_v4 }
  0xd6   : > { %v646_v19 = vand.u32 2147483647, %v644_v12  ;;  %v589_v16 = vadd.f32 %v588_v13, %v587_v5 }
  0xd7   : > { %v647_v18 = vsub.f32 %v645_v11, %v622_v10 }
  0xd8   : > { %590 = vadd.xlane.f32.xlu0 %v589_v16  ;;  %v648_v21 = vsub.f32 %v646_v19, %v623_v14 }
  0xd9   : > { %v649_v24 = vand.u32 2147483647, %v647_v18 }
  0xda   : > { %v650_v25 = vand.u32 2147483647, %v648_v21 }
  0xdb   : > { %v651_v26 = vmul.f32 %v649_v24, %v1265_v6 }
  0xdc   : > { %736 = vadd.xlane.f32.xlu0 %v735_v20  ;;  %v652_v27 = vmul.f32 %v650_v25, %v1267_v7 }
  0xde   : > { %v653_v28 = vadd.f32 %v652_v27, %v651_v26 }
  0xe0   : > { %654 = vadd.xlane.f32.xlu1 %v653_v28 }
 0x165   : > { %v591_v29 = vpop.xlane.xlu0 %590 }
 0x166   : > { %v592_v30 = vrot.slane %v591_v29, 4 }
 0x168   : > { %v593_v31 = vadd.f32 %v592_v30, %v591_v29 }
 0x169   : > { %v737_v32 = vpop.xlane.xlu0 %736 }
 0x16a   : > { %v594_v33 = vrot.slane %v593_v31, 2  ;;  %v738_v34 = vrot.slane %v737_v32, 4 }
 0x16c   : > { %v739_v35 = vadd.f32 %v738_v34, %v737_v32  ;;  %v595_v36 = vadd.f32 %v594_v33, %v593_v31 }
 0x16d   : > { %v655_v37 = vpop.xlane.xlu1 %654 }
 0x16e   : > { %v740_v38 = vrot.slane %v739_v35, 2  ;;  %v656_v39 = vrot.slane %v655_v37, 4  ;;  %v596_v22 = vrot.slane %v595_v36, 1 }
 0x170   : > { %v657_v40 = vadd.f32 %v656_v39, %v655_v37  ;;  %v597_v41 = vadd.f32 %v596_v22, %v595_v36  ;;  %v741_v6 = vadd.f32 %v740_v38, %v739_v35 }
 0x172   : > { %v658_v23 = vrot.slane %v657_v40, 2  ;;  %973 = vpush %v597_v41  ;;  %v742_v42 = vrot.slane %v741_v6, 1 }
 0x174   : > { %v659_v7 = vadd.f32 %v658_v23, %v657_v40  ;;  %v743_v45 = vadd.f32 %v742_v42, %v741_v6 }
 0x176   : > { %v660_v43 = vrot.slane %v659_v7, 1 }
 0x178   : > { %v661_v44 = vadd.f32 %v660_v43, %v659_v7 }
 0x17a   : > { %975 = vpush %v661_v44 }
 0x17b   : > { %977 = vpush %v743_v45 }
 0x1a3   : > { %s974_s20 = spop %973 }
 0x1ab   : > { %s976_s23 = spop %975 }
 0x1ac   : > { %s663_s15 = sadd.f32 %s976_s23, %s974_s20  ;;  %s978_s25 = spop %977 }
 0x1ae   : > { %s745_s11 = sadd.f32 %s978_s25, %s663_s15 }
 0x1b0   : > { %s747_s17 = sadd.f32 %s746_s29, %s745_s11 }
 0x1b2   : > { %749 = sst [smem:[#allocation9]] %s747_s17 }
 0x1b3   : > { %1077 = shalt.err (!%p1074_p1)
}
 0x1b4   : > { %s1136_s19 = smov [#allocation9]  }
 0x1b5   : > { %993 = dma.smem_to_vmem (%p1403_p8), %s1136_s19, 16, %s758_s24, [#allocation8]  }
 0x1b6   : > { %1109 = dma.done.wait (%p1403_p8), [#allocation8], 16  }
 0x1b7   : > { %1111 = vsyncadd (%p1403_p8), [#allocation8], 4294967280 }
 0x1b8   : > { %765 = sfence }
 0x1b9 PF: > { %s19_s28 = sadd.s32 1, %s1130_s28   ;;  %s1451_s21 = sld [smem:[#allocation18_spill]] }
 0x1ba   : > { %p16_p2 = scmp.ge.s32.totalorder %s19_s28, 6   ;;  %s1452_s24 = smov %s1122_s26 }
 0x1bb   : > { %s1453_s25 = smov %s1126_s27  ;;  %s1454_s26 = smov %s1457_s30 }
 0x1bc   :  { %18 = sbr.rel (!%p16_p2) target bundleno = 6 (0x6), region = 214 }
 0x1bf   : > { %s1455_s27 = smov %s1451_s21 }
 0x1c3   :  { %771 = vsyncpa [#allocation7], 1 }
 0x1c4   :  { %773 = vsyncpa [#allocation7 + $0x1], 1 }
 0x1c5   :  { %774 = vsyncpa [#allocation8], 1 }
 0x1c6   :  { %776 = vsyncpa [#allocation8 + $0x1], 1 }
 0x1c7   :  { %777 = vsyncmov [#allocation5] }
 0x1ca   :  { %s778_s22 = vpop.sfrf %777 }
 0x1cb   :  { %p970_p4 = scmp.ne.s32.totalorder %s778_s22, 0 }
 0x1cd   :  { %782 = shalt.err (%p970_p4)  }
 0x1ce   :  { %784 = vsyncmov [#allocation5 + $0x1] }
 0x1d1   :  { %s785_s9 = vpop.sfrf %784 }
 0x1d2   :  { %p971_p3 = scmp.ne.s32.totalorder %s785_s9, 0 }
 0x1d4   :  { %789 = shalt.err (%p971_p3)  }
 0x1d5   :  { %791 = vsyncmov [#allocation5 + $0x2] }
 0x1d8   :  { %s792_s10 = vpop.sfrf %791 }
 0x1d9   :  { %p972_p5 = scmp.ne.s32.totalorder %s792_s10, 0 }
 0x1db   :  { %796 = shalt.err (%p972_p5)  }

</bundles_post_ra>
